<compile_context>
chip_gen: v7x
topology: tpu7x:2x2x1
jax: 0.10.0
libtpu: 0.0.40
codegen_flags: <defaults>
</compile_context>

<pallas_src>
from functools import partial

import jax
import jax.numpy as jnp
import numpy as np
from jax.experimental import pallas as pl
from jax.experimental.pallas import tpu as pltpu


def _softmax_rows(s):
    """Row softmax: explicit max-subtract + exp (EUP) + approx reciprocal (EUP)."""
    m = jnp.max(s, axis=-1, keepdims=True)
    p = jnp.exp(s - m)
    l = jnp.sum(p, axis=-1, keepdims=True)
    return p * pl.reciprocal(l, approx=True)


def _fused_attn_kernel(x_ref, wqkv_ref, wproj_ref, bproj_ref, o_ref, acc_ref,
                       *, num_heads, nr_channels, scale, matmul_dtype):
    """One batch element per grid step; all heads handled inside.

    Block shapes:
      x_ref     (1, N, D)   lane dim = D
      wqkv_ref  (D, 3D)     VMEM-resident across the grid (constant index_map)
      wproj_ref (D, D)      VMEM-resident across the grid
      bproj_ref (1, D)
      o_ref     (1, N, D)
      acc_ref   VMEM (N, D) f32 scratch holding the pre-projection output,
                assembled directly in the final (B, N, D) = (B, C*t, H*d) order.
    """
    _, N, D = x_ref.shape
    H = num_heads
    C = nr_channels
    d = D // H
    t = N // C

    # ---- pool tokens BEFORE the qkv projection (exact by linearity) ---------
    # Token n = c*t + tau; channel token c = mean over tau, time token tau =
    # mean over c.  mean(x) @ W == mean(x @ W) since qkv has no bias and
    # q_norm/k_norm are Identity (if qk_norm were enabled this re-association
    # would not hold and the projection would have to run on all N tokens).
    x_ctd = x_ref[0].reshape(C, t, D)                                # (C, t, D)
    xc = jnp.mean(x_ctd, axis=1)                                     # (C, D)
    xt = jnp.mean(x_ctd, axis=0)                                     # (t, D)

    qkv_c = jnp.dot(xc.astype(matmul_dtype),
                    wqkv_ref[...].astype(matmul_dtype),
                    preferred_element_type=jnp.float32)              # (C, 3D)
    # time tokens only need q and k (their v is never used by the module)
    qk_t = jnp.dot(xt.astype(matmul_dtype),
                   wqkv_ref[:, :2 * D].astype(matmul_dtype),
                   preferred_element_type=jnp.float32)               # (t, 2D)

    # fold the attention scale into q once for all heads
    qc = qkv_c[:, 0 * D:1 * D] * scale
    kc = qkv_c[:, 1 * D:2 * D]
    vc = qkv_c[:, 2 * D:3 * D]
    qt = qk_t[:, 0 * D:1 * D] * scale
    kt = qk_t[:, 1 * D:2 * D]

    # ---- channel + temporal attention, all heads per grid step --------------
    # H is small and static -> unrolled; per-head math is a handful of tiny
    # matmuls, negligible next to the (N, D) x (D, D) projection below.
    for h in range(H):
        sl = slice(h * d, (h + 1) * d)

        # channel attention over the C channel tokens
        s_c = jnp.dot(qc[:, sl], kc[:, sl].T,
                      preferred_element_type=jnp.float32)            # (C, C)
        a_c = _softmax_rows(s_c)
        vat = jnp.dot(a_c, vc[:, sl],
                      preferred_element_type=jnp.float32)            # (C, d)

        # temporal attention over the t time tokens.  Its value rows are all
        # identical (vat broadcast over time), so attn_t @ v_exp factorises
        # exactly to rowsum(attn_t) * vat (same math, re-associated); the
        # (t, C*d) expanded value is never materialised in VMEM.
        s_t = jnp.dot(qt[:, sl], kt[:, sl].T,
                      preferred_element_type=jnp.float32)            # (t, t)
        a_t = _softmax_rows(s_t)
        w_t = jnp.sum(a_t, axis=-1, keepdims=True)                   # (t, 1)

        # write directly in final (B, N, D) order: row = c*t + tau, col = h*d + j
        acc_ref[:, sl] = (vat[:, None, :] * w_t[None, :, :]).reshape(C * t, d)

    # ---- fused output projection + bias (MXU) --------------------------------
    y = jnp.dot(acc_ref[...].astype(matmul_dtype),
                wproj_ref[...].astype(matmul_dtype),
                preferred_element_type=jnp.float32) + bproj_ref[...]
    o_ref[0] = y.astype(o_ref.dtype)


def bottleneck_split_attention(x, w_qkv, w_proj, b_proj, *, num_heads, nr_channels,
                               qk_scale=None, matmul_dtype=jnp.float32):
    """x: (B, N, D).  w_qkv: (D, 3D), w_proj: (D, D), b_proj: (D,).

    matmul_dtype: set jnp.bfloat16 on v6e/v7x for 2x MXU rate (f32 accumulate);
    keep jnp.float32 on v5e.
    """
    B, N, D = x.shape
    H = num_heads
    C = nr_channels
    assert D % H == 0 and N % C == 0
    d = D // H
    scale = float(qk_scale) if qk_scale is not None else float(d) ** -0.5

    kernel = partial(_fused_attn_kernel, num_heads=H, nr_channels=C,
                     scale=scale, matmul_dtype=matmul_dtype)

    # NOTE: for very large N / D, add grid axes to tile the projection matmul
    # (K-tiles with a pl.when-initialised f32 accumulator) and re-derive block
    # sizes against VMEM (64 MiB physical on v7x); at module-typical sizes the
    # per-batch (N, D) slab plus both weights fits comfortably.
    return pl.pallas_call(
        kernel,
        out_shape=jax.ShapeDtypeStruct((B, N, D), x.dtype),
        grid=(B,),
        in_specs=[
            pl.BlockSpec((1, N, D), lambda b: (b, 0, 0)),      # activations
            pl.BlockSpec((D, 3 * D), lambda b: (0, 0)),        # qkv weight (resident)
            pl.BlockSpec((D, D), lambda b: (0, 0)),            # proj weight (resident)
            pl.BlockSpec((1, D), lambda b: (0, 0)),            # proj bias
        ],
        out_specs=pl.BlockSpec((1, N, D), lambda b: (b, 0, 0)),
        scratch_shapes=[pltpu.VMEM((N, D), jnp.float32)],
        compiler_params=pltpu.CompilerParams(
            dimension_semantics=("parallel",)),
    )(x, w_qkv, w_proj, b_proj.reshape(1, -1))


# ------------------------------ pure-JAX reference ----------------------------

def _reference(x, w_qkv, w_proj, b_proj, H, C):
    B, N, D = x.shape
    d = D // H
    t = N // C
    scale = d ** (-0.5)

    def attn(q, k, v):
        a = jax.nn.softmax(q @ jnp.swapaxes(k, -2, -1) * scale, axis=-1)
        return a @ v

    qkv = (x @ w_qkv).reshape(B, N, 3, H, d).transpose(2, 0, 3, 1, 4)
    q, k, v = qkv[0], qkv[1], qkv[2]
    q = q.reshape(B, H, C, t, d)
    k = k.reshape(B, H, C, t, d)
    v = v.reshape(B, H, C, t, d)
    v2 = attn(q.mean(-2), k.mean(-2), v.mean(-2))                      # (B,H,C,d)
    qt = jnp.swapaxes(q, 2, 3).mean(-2)                                # (B,H,t,d)
    kt = jnp.swapaxes(k, 2, 3).mean(-2)
    v_exp = jnp.broadcast_to(v2[:, :, None], (B, H, t, C, d)).reshape(B, H, t, C * d)
    xo = attn(qt, kt, v_exp)                                           # (B,H,t,C*d)
    xo = xo.reshape(B, H, t, C, d).transpose(0, 3, 2, 1, 4).reshape(B, N, D)
    return xo @ w_proj + b_proj


# ----------------------------------- main --------------------------------------

if __name__ == "__main__":
    B, C, t, H, d = 2, 4, 4, 8, 4
    N, D = C * t, H * d                      # N = 16, D = 32

    key = jax.random.PRNGKey(0)
    k1, k2, k3, k4 = jax.random.split(key, 4)
    x = jax.random.normal(k1, (B, N, D), jnp.float32)
    # nn.Linear shapes: qkv weight (3D, D) stored pre-transposed as (D, 3D);
    # proj weight (D, D) + bias (D,).  qkv_bias=False (module default).
    w_qkv = jax.random.normal(k2, (D, 3 * D), jnp.float32) * (D ** -0.5)
    w_proj = jax.random.normal(k3, (D, D), jnp.float32) * (D ** -0.5)
    b_proj = jax.random.normal(k4, (D,), jnp.float32) * 0.02

    out = bottleneck_split_attention(
        x, w_qkv, w_proj, b_proj, num_heads=H, nr_channels=C)
    out = jax.block_until_ready(out)

    assert out.shape == (B, N, D), out.shape
    ref = _reference(x, w_qkv, w_proj, b_proj, H, C)
    # tolerance 2e-3: approx EUP reciprocal in the in-kernel softmax.
    np.testing.assert_allclose(np.asarray(out), np.asarray(ref), atol=2e-3, rtol=2e-3)

    print("KERNEL_OK")
</pallas_src>

<mosaic_0001>
module attributes {stable_mosaic.version = 11 : i64} {
  func.func @_fused_attn_kernel(%arg0: i32, %arg1: memref<1x16x32xf32, #tpu.memory_space<vmem>>, %arg2: memref<32x96xf32, #tpu.memory_space<vmem>>, %arg3: memref<32x32xf32, #tpu.memory_space<vmem>>, %arg4: memref<1x32xf32, #tpu.memory_space<vmem>>, %arg5: memref<1x16x32xf32, #tpu.memory_space<vmem>>, %arg6: memref<16x32xf32, #tpu.memory_space<vmem>>) attributes {dimension_semantics = [#tpu.dimension_semantics<parallel>], iteration_bounds = array<i64: 2>, scalar_prefetch = 0 : i64, scratch_operands = 1 : i64, tpu.core_type = #tpu.core_type<tc>, window_params = [{transform_indices = @transform_0, window_bounds = array<i64: 1, 16, 32>}, {pipeline_mode = #tpu.pipeline_mode<synchronous>, transform_indices = @transform_1, window_bounds = array<i64: 32, 96>}, {pipeline_mode = #tpu.pipeline_mode<synchronous>, transform_indices = @transform_2, window_bounds = array<i64: 32, 32>}, {pipeline_mode = #tpu.pipeline_mode<synchronous>, transform_indices = @transform_3, window_bounds = array<i64: 1, 32>}, {transform_indices = @transform_4, window_bounds = array<i64: 1, 16, 32>}]} {
    %c0 = arith.constant 0 : index
    %c0_0 = arith.constant 0 : index
    %c0_1 = arith.constant 0 : index
    %0 = vector.load %arg1[%c0, %c0_0, %c0_1] : memref<1x16x32xf32, #tpu.memory_space<vmem>>, vector<1x16x32xf32>
    %1 = vector.shape_cast %0 : vector<1x16x32xf32> to vector<16x32xf32>
    %2 = vector.shape_cast %1 : vector<16x32xf32> to vector<4x4x32xf32>
    %cst = arith.constant dense<0.000000e+00> : vector<4x32xf32>
    %3 = vector.multi_reduction <add>, %2, %cst [1] : vector<4x4x32xf32> to vector<4x32xf32>
    %cst_2 = arith.constant 4.000000e+00 : f32
    %4 = vector.broadcast %cst_2 : f32 to vector<4x32xf32>
    %5 = arith.divf %3, %4 : vector<4x32xf32>
    %cst_3 = arith.constant dense<0.000000e+00> : vector<4x32xf32>
    %6 = vector.multi_reduction <add>, %2, %cst_3 [0] : vector<4x4x32xf32> to vector<4x32xf32>
    %cst_4 = arith.constant 4.000000e+00 : f32
    %7 = vector.broadcast %cst_4 : f32 to vector<4x32xf32>
    %8 = arith.divf %6, %7 : vector<4x32xf32>
    %c0_5 = arith.constant 0 : index
    %c0_6 = arith.constant 0 : index
    %9 = vector.load %arg2[%c0_5, %c0_6] : memref<32x96xf32, #tpu.memory_space<vmem>>, vector<32x96xf32>
    %cst_7 = arith.constant dense<0.000000e+00> : vector<4x96xf32>
    %10 = tpu.matmul %5, %9, %cst_7 {dimension_numbers = #tpu.dot_dimension_numbers<[1], [0], [0], [1], [0, 0, 1, 1], [], []>} : vector<4x32xf32>, vector<32x96xf32>, vector<4x96xf32> -> vector<4x96xf32>
    %c0_8 = arith.constant 0 : index
    %c0_9 = arith.constant 0 : index
    %11 = vector.load %arg2[%c0_8, %c0_9] : memref<32x96xf32, #tpu.memory_space<vmem>>, vector<32x64xf32>
    %cst_10 = arith.constant dense<0.000000e+00> : vector<4x64xf32>
    %12 = tpu.matmul %8, %11, %cst_10 {dimension_numbers = #tpu.dot_dimension_numbers<[1], [0], [0], [1], [0, 0, 1, 1], [], []>} : vector<4x32xf32>, vector<32x64xf32>, vector<4x64xf32> -> vector<4x64xf32>
    %13 = vector.extract_strided_slice %10 {offsets = [0, 0], sizes = [4, 32], strides = [1, 1]} : vector<4x96xf32> to vector<4x32xf32>
    %cst_11 = arith.constant 5.000000e-01 : f32
    %14 = vector.broadcast %cst_11 : f32 to vector<4x32xf32>
    %15 = arith.mulf %13, %14 : vector<4x32xf32>
    %16 = vector.extract_strided_slice %10 {offsets = [0, 32], sizes = [4, 32], strides = [1, 1]} : vector<4x96xf32> to vector<4x32xf32>
    %17 = vector.extract_strided_slice %10 {offsets = [0, 64], sizes = [4, 32], strides = [1, 1]} : vector<4x96xf32> to vector<4x32xf32>
    %18 = vector.extract_strided_slice %12 {offsets = [0, 0], sizes = [4, 32], strides = [1, 1]} : vector<4x64xf32> to vector<4x32xf32>
    %cst_12 = arith.constant 5.000000e-01 : f32
    %19 = vector.broadcast %cst_12 : f32 to vector<4x32xf32>
    %20 = arith.mulf %18, %19 : vector<4x32xf32>
    %21 = vector.extract_strided_slice %12 {offsets = [0, 32], sizes = [4, 32], strides = [1, 1]} : vector<4x64xf32> to vector<4x32xf32>
    %22 = vector.extract_strided_slice %15 {offsets = [0, 0], sizes = [4, 4], strides = [1, 1]} : vector<4x32xf32> to vector<4x4xf32>
    %23 = vector.extract_strided_slice %16 {offsets = [0, 0], sizes = [4, 4], strides = [1, 1]} : vector<4x32xf32> to vector<4x4xf32>
    %24 = tpu.transpose %23, [1, 0] : vector<4x4xf32> -> vector<4x4xf32>
    %cst_13 = arith.constant dense<0.000000e+00> : vector<4x4xf32>
    %25 = tpu.matmul %22, %24, %cst_13 {dimension_numbers = #tpu.dot_dimension_numbers<[1], [0], [0], [1], [0, 0, 1, 1], [], []>} : vector<4x4xf32>, vector<4x4xf32>, vector<4x4xf32> -> vector<4x4xf32>
    %cst_14 = arith.constant dense<0xFF800000> : vector<4xf32>
    %26 = vector.multi_reduction <maximumf>, %25, %cst_14 [1] : vector<4x4xf32> to vector<4xf32>
    %27 = vector.shape_cast %26 : vector<4xf32> to vector<4x1xf32>
    %28 = vector.broadcast %27 : vector<4x1xf32> to vector<4x4xf32>
    %29 = arith.subf %25, %28 : vector<4x4xf32>
    %30 = math.exp %29 : vector<4x4xf32>
    %cst_15 = arith.constant dense<0.000000e+00> : vector<4xf32>
    %31 = vector.multi_reduction <add>, %30, %cst_15 [1] : vector<4x4xf32> to vector<4xf32>
    %32 = vector.shape_cast %31 : vector<4xf32> to vector<4x1xf32>
    %33 = tpu.reciprocal %32 {approx = true} : vector<4x1xf32> -> vector<4x1xf32>
    %34 = vector.broadcast %33 : vector<4x1xf32> to vector<4x4xf32>
    %35 = arith.mulf %30, %34 : vector<4x4xf32>
    %36 = vector.extract_strided_slice %17 {offsets = [0, 0], sizes = [4, 4], strides = [1, 1]} : vector<4x32xf32> to vector<4x4xf32>
    %cst_16 = arith.constant dense<0.000000e+00> : vector<4x4xf32>
    %37 = tpu.matmul %35, %36, %cst_16 {dimension_numbers = #tpu.dot_dimension_numbers<[1], [0], [0], [1], [0, 0, 1, 1], [], []>} : vector<4x4xf32>, vector<4x4xf32>, vector<4x4xf32> -> vector<4x4xf32>
    %38 = vector.extract_strided_slice %20 {offsets = [0, 0], sizes = [4, 4], strides = [1, 1]} : vector<4x32xf32> to vector<4x4xf32>
    %39 = vector.extract_strided_slice %21 {offsets = [0, 0], sizes = [4, 4], strides = [1, 1]} : vector<4x32xf32> to vector<4x4xf32>
    %40 = tpu.transpose %39, [1, 0] : vector<4x4xf32> -> vector<4x4xf32>
    %cst_17 = arith.constant dense<0.000000e+00> : vector<4x4xf32>
    %41 = tpu.matmul %38, %40, %cst_17 {dimension_numbers = #tpu.dot_dimension_numbers<[1], [0], [0], [1], [0, 0, 1, 1], [], []>} : vector<4x4xf32>, vector<4x4xf32>, vector<4x4xf32> -> vector<4x4xf32>
    %cst_18 = arith.constant dense<0xFF800000> : vector<4xf32>
    %42 = vector.multi_reduction <maximumf>, %41, %cst_18 [1] : vector<4x4xf32> to vector<4xf32>
    %43 = vector.shape_cast %42 : vector<4xf32> to vector<4x1xf32>
    %44 = vector.broadcast %43 : vector<4x1xf32> to vector<4x4xf32>
    %45 = arith.subf %41, %44 : vector<4x4xf32>
    %46 = math.exp %45 : vector<4x4xf32>
    %cst_19 = arith.constant dense<0.000000e+00> : vector<4xf32>
    %47 = vector.multi_reduction <add>, %46, %cst_19 [1] : vector<4x4xf32> to vector<4xf32>
    %48 = vector.shape_cast %47 : vector<4xf32> to vector<4x1xf32>
    %49 = tpu.reciprocal %48 {approx = true} : vector<4x1xf32> -> vector<4x1xf32>
    %50 = vector.broadcast %49 : vector<4x1xf32> to vector<4x4xf32>
    %51 = arith.mulf %46, %50 : vector<4x4xf32>
    %cst_20 = arith.constant dense<0.000000e+00> : vector<4xf32>
    %52 = vector.multi_reduction <add>, %51, %cst_20 [1] : vector<4x4xf32> to vector<4xf32>
    %53 = vector.shape_cast %52 : vector<4xf32> to vector<4x1xf32>
    %54 = vector.shape_cast %37 : vector<4x4xf32> to vector<4x1x4xf32>
    %55 = vector.shape_cast %53 : vector<4x1xf32> to vector<1x4x1xf32>
    %56 = vector.broadcast %54 : vector<4x1x4xf32> to vector<4x4x4xf32>
    %57 = vector.broadcast %55 : vector<1x4x1xf32> to vector<4x4x4xf32>
    %58 = arith.mulf %56, %57 : vector<4x4x4xf32>
    %59 = vector.shape_cast %58 : vector<4x4x4xf32> to vector<16x4xf32>
    %c0_21 = arith.constant 0 : index
    %c0_22 = arith.constant 0 : index
    %60 = vector.load %arg6[%c0_21, %c0_22] : memref<16x32xf32, #tpu.memory_space<vmem>>, vector<16x4xf32>
    tpu.vector_store %arg6[%c0_21, %c0_22], %59 {strides = array<i32>} : memref<16x32xf32, #tpu.memory_space<vmem>>, vector<16x4xf32>,
    %61 = vector.extract_strided_slice %15 {offsets = [0, 4], sizes = [4, 4], strides = [1, 1]} : vector<4x32xf32> to vector<4x4xf32>
    %62 = vector.extract_strided_slice %16 {offsets = [0, 4], sizes = [4, 4], strides = [1, 1]} : vector<4x32xf32> to vector<4x4xf32>
    %63 = tpu.transpose %62, [1, 0] : vector<4x4xf32> -> vector<4x4xf32>
    %cst_23 = arith.constant dense<0.000000e+00> : vector<4x4xf32>
    %64 = tpu.matmul %61, %63, %cst_23 {dimension_numbers = #tpu.dot_dimension_numbers<[1], [0], [0], [1], [0, 0, 1, 1], [], []>} : vector<4x4xf32>, vector<4x4xf32>, vector<4x4xf32> -> vector<4x4xf32>
    %cst_24 = arith.constant dense<0xFF800000> : vector<4xf32>
    %65 = vector.multi_reduction <maximumf>, %64, %cst_24 [1] : vector<4x4xf32> to vector<4xf32>
    %66 = vector.shape_cast %65 : vector<4xf32> to vector<4x1xf32>
    %67 = vector.broadcast %66 : vector<4x1xf32> to vector<4x4xf32>
    %68 = arith.subf %64, %67 : vector<4x4xf32>
    %69 = math.exp %68 : vector<4x4xf32>
    %cst_25 = arith.constant dense<0.000000e+00> : vector<4xf32>
    %70 = vector.multi_reduction <add>, %69, %cst_25 [1] : vector<4x4xf32> to vector<4xf32>
    %71 = vector.shape_cast %70 : vector<4xf32> to vector<4x1xf32>
    %72 = tpu.reciprocal %71 {approx = true} : vector<4x1xf32> -> vector<4x1xf32>
    %73 = vector.broadcast %72 : vector<4x1xf32> to vector<4x4xf32>
    %74 = arith.mulf %69, %73 : vector<4x4xf32>
    %75 = vector.extract_strided_slice %17 {offsets = [0, 4], sizes = [4, 4], strides = [1, 1]} : vector<4x32xf32> to vector<4x4xf32>
    %cst_26 = arith.constant dense<0.000000e+00> : vector<4x4xf32>
    %76 = tpu.matmul %74, %75, %cst_26 {dimension_numbers = #tpu.dot_dimension_numbers<[1], [0], [0], [1], [0, 0, 1, 1], [], []>} : vector<4x4xf32>, vector<4x4xf32>, vector<4x4xf32> -> vector<4x4xf32>
    %77 = vector.extract_strided_slice %20 {offsets = [0, 4], sizes = [4, 4], strides = [1, 1]} : vector<4x32xf32> to vector<4x4xf32>
    %78 = vector.extract_strided_slice %21 {offsets = [0, 4], sizes = [4, 4], strides = [1, 1]} : vector<4x32xf32> to vector<4x4xf32>
    %79 = tpu.transpose %78, [1, 0] : vector<4x4xf32> -> vector<4x4xf32>
    %cst_27 = arith.constant dense<0.000000e+00> : vector<4x4xf32>
    %80 = tpu.matmul %77, %79, %cst_27 {dimension_numbers = #tpu.dot_dimension_numbers<[1], [0], [0], [1], [0, 0, 1, 1], [], []>} : vector<4x4xf32>, vector<4x4xf32>, vector<4x4xf32> -> vector<4x4xf32>
    %cst_28 = arith.constant dense<0xFF800000> : vector<4xf32>
    %81 = vector.multi_reduction <maximumf>, %80, %cst_28 [1] : vector<4x4xf32> to vector<4xf32>
    %82 = vector.shape_cast %81 : vector<4xf32> to vector<4x1xf32>
    %83 = vector.broadcast %82 : vector<4x1xf32> to vector<4x4xf32>
    %84 = arith.subf %80, %83 : vector<4x4xf32>
    %85 = math.exp %84 : vector<4x4xf32>
    %cst_29 = arith.constant dense<0.000000e+00> : vector<4xf32>
    %86 = vector.multi_reduction <add>, %85, %cst_29 [1] : vector<4x4xf32> to vector<4xf32>
    %87 = vector.shape_cast %86 : vector<4xf32> to vector<4x1xf32>
    %88 = tpu.reciprocal %87 {approx = true} : vector<4x1xf32> -> vector<4x1xf32>
    %89 = vector.broadcast %88 : vector<4x1xf32> to vector<4x4xf32>
    %90 = arith.mulf %85, %89 : vector<4x4xf32>
    %cst_30 = arith.constant dense<0.000000e+00> : vector<4xf32>
    %91 = vector.multi_reduction <add>, %90, %cst_30 [1] : vector<4x4xf32> to vector<4xf32>
    %92 = vector.shape_cast %91 : vector<4xf32> to vector<4x1xf32>
    %93 = vector.shape_cast %76 : vector<4x4xf32> to vector<4x1x4xf32>
    %94 = vector.shape_cast %92 : vector<4x1xf32> to vector<1x4x1xf32>
    %95 = vector.broadcast %93 : vector<4x1x4xf32> to vector<4x4x4xf32>
    %96 = vector.broadcast %94 : vector<1x4x1xf32> to vector<4x4x4xf32>
    %97 = arith.mulf %95, %96 : vector<4x4x4xf32>
    %98 = vector.shape_cast %97 : vector<4x4x4xf32> to vector<16x4xf32>
    %c0_31 = arith.constant 0 : index
    %c4 = arith.constant 4 : index
    %99 = vector.load %arg6[%c0_31, %c4] : memref<16x32xf32, #tpu.memory_space<vmem>>, vector<16x4xf32>
    tpu.vector_store %arg6[%c0_31, %c4], %98 {strides = array<i32>} : memref<16x32xf32, #tpu.memory_space<vmem>>, vector<16x4xf32>,
    %100 = vector.extract_strided_slice %15 {offsets = [0, 8], sizes = [4, 4], strides = [1, 1]} : vector<4x32xf32> to vector<4x4xf32>
    %101 = vector.extract_strided_slice %16 {offsets = [0, 8], sizes = [4, 4], strides = [1, 1]} : vector<4x32xf32> to vector<4x4xf32>
    %102 = tpu.transpose %101, [1, 0] : vector<4x4xf32> -> vector<4x4xf32>
    %cst_32 = arith.constant dense<0.000000e+00> : vector<4x4xf32>
    %103 = tpu.matmul %100, %102, %cst_32 {dimension_numbers = #tpu.dot_dimension_numbers<[1], [0], [0], [1], [0, 0, 1, 1], [], []>} : vector<4x4xf32>, vector<4x4xf32>, vector<4x4xf32> -> vector<4x4xf32>
    %cst_33 = arith.constant dense<0xFF800000> : vector<4xf32>
    %104 = vector.multi_reduction <maximumf>, %103, %cst_33 [1] : vector<4x4xf32> to vector<4xf32>
    %105 = vector.shape_cast %104 : vector<4xf32> to vector<4x1xf32>
    %106 = vector.broadcast %105 : vector<4x1xf32> to vector<4x4xf32>
    %107 = arith.subf %103, %106 : vector<4x4xf32>
    %108 = math.exp %107 : vector<4x4xf32>
    %cst_34 = arith.constant dense<0.000000e+00> : vector<4xf32>
    %109 = vector.multi_reduction <add>, %108, %cst_34 [1] : vector<4x4xf32> to vector<4xf32>
    %110 = vector.shape_cast %109 : vector<4xf32> to vector<4x1xf32>
    %111 = tpu.reciprocal %110 {approx = true} : vector<4x1xf32> -> vector<4x1xf32>
    %112 = vector.broadcast %111 : vector<4x1xf32> to vector<4x4xf32>
    %113 = arith.mulf %108, %112 : vector<4x4xf32>
    %114 = vector.extract_strided_slice %17 {offsets = [0, 8], sizes = [4, 4], strides = [1, 1]} : vector<4x32xf32> to vector<4x4xf32>
    %cst_35 = arith.constant dense<0.000000e+00> : vector<4x4xf32>
    %115 = tpu.matmul %113, %114, %cst_35 {dimension_numbers = #tpu.dot_dimension_numbers<[1], [0], [0], [1], [0, 0, 1, 1], [], []>} : vector<4x4xf32>, vector<4x4xf32>, vector<4x4xf32> -> vector<4x4xf32>
    %116 = vector.extract_strided_slice %20 {offsets = [0, 8], sizes = [4, 4], strides = [1, 1]} : vector<4x32xf32> to vector<4x4xf32>
    %117 = vector.extract_strided_slice %21 {offsets = [0, 8], sizes = [4, 4], strides = [1, 1]} : vector<4x32xf32> to vector<4x4xf32>
    %118 = tpu.transpose %117, [1, 0] : vector<4x4xf32> -> vector<4x4xf32>
    %cst_36 = arith.constant dense<0.000000e+00> : vector<4x4xf32>
    %119 = tpu.matmul %116, %118, %cst_36 {dimension_numbers = #tpu.dot_dimension_numbers<[1], [0], [0], [1], [0, 0, 1, 1], [], []>} : vector<4x4xf32>, vector<4x4xf32>, vector<4x4xf32> -> vector<4x4xf32>
    %cst_37 = arith.constant dense<0xFF800000> : vector<4xf32>
    %120 = vector.multi_reduction <maximumf>, %119, %cst_37 [1] : vector<4x4xf32> to vector<4xf32>
    %121 = vector.shape_cast %120 : vector<4xf32> to vector<4x1xf32>
    %122 = vector.broadcast %121 : vector<4x1xf32> to vector<4x4xf32>
    %123 = arith.subf %119, %122 : vector<4x4xf32>
    %124 = math.exp %123 : vector<4x4xf32>
    %cst_38 = arith.constant dense<0.000000e+00> : vector<4xf32>
    %125 = vector.multi_reduction <add>, %124, %cst_38 [1] : vector<4x4xf32> to vector<4xf32>
    %126 = vector.shape_cast %125 : vector<4xf32> to vector<4x1xf32>
    %127 = tpu.reciprocal %126 {approx = true} : vector<4x1xf32> -> vector<4x1xf32>
    %128 = vector.broadcast %127 : vector<4x1xf32> to vector<4x4xf32>
    %129 = arith.mulf %124, %128 : vector<4x4xf32>
    %cst_39 = arith.constant dense<0.000000e+00> : vector<4xf32>
    %130 = vector.multi_reduction <add>, %129, %cst_39 [1] : vector<4x4xf32> to vector<4xf32>
    %131 = vector.shape_cast %130 : vector<4xf32> to vector<4x1xf32>
    %132 = vector.shape_cast %115 : vector<4x4xf32> to vector<4x1x4xf32>
    %133 = vector.shape_cast %131 : vector<4x1xf32> to vector<1x4x1xf32>
    %134 = vector.broadcast %132 : vector<4x1x4xf32> to vector<4x4x4xf32>
    %135 = vector.broadcast %133 : vector<1x4x1xf32> to vector<4x4x4xf32>
    %136 = arith.mulf %134, %135 : vector<4x4x4xf32>
    %137 = vector.shape_cast %136 : vector<4x4x4xf32> to vector<16x4xf32>
    %c0_40 = arith.constant 0 : index
    %c8 = arith.constant 8 : index
    %138 = vector.load %arg6[%c0_40, %c8] : memref<16x32xf32, #tpu.memory_space<vmem>>, vector<16x4xf32>
    tpu.vector_store %arg6[%c0_40, %c8], %137 {strides = array<i32>} : memref<16x32xf32, #tpu.memory_space<vmem>>, vector<16x4xf32>,
    %139 = vector.extract_strided_slice %15 {offsets = [0, 12], sizes = [4, 4], strides = [1, 1]} : vector<4x32xf32> to vector<4x4xf32>
    %140 = vector.extract_strided_slice %16 {offsets = [0, 12], sizes = [4, 4], strides = [1, 1]} : vector<4x32xf32> to vector<4x4xf32>
    %141 = tpu.transpose %140, [1, 0] : vector<4x4xf32> -> vector<4x4xf32>
    %cst_41 = arith.constant dense<0.000000e+00> : vector<4x4xf32>
    %142 = tpu.matmul %139, %141, %cst_41 {dimension_numbers = #tpu.dot_dimension_numbers<[1], [0], [0], [1], [0, 0, 1, 1], [], []>} : vector<4x4xf32>, vector<4x4xf32>, vector<4x4xf32> -> vector<4x4xf32>
    %cst_42 = arith.constant dense<0xFF800000> : vector<4xf32>
    %143 = vector.multi_reduction <maximumf>, %142, %cst_42 [1] : vector<4x4xf32> to vector<4xf32>
    %144 = vector.shape_cast %143 : vector<4xf32> to vector<4x1xf32>
    %145 = vector.broadcast %144 : vector<4x1xf32> to vector<4x4xf32>
    %146 = arith.subf %142, %145 : vector<4x4xf32>
    %147 = math.exp %146 : vector<4x4xf32>
    %cst_43 = arith.constant dense<0.000000e+00> : vector<4xf32>
    %148 = vector.multi_reduction <add>, %147, %cst_43 [1] : vector<4x4xf32> to vector<4xf32>
    %149 = vector.shape_cast %148 : vector<4xf32> to vector<4x1xf32>
    %150 = tpu.reciprocal %149 {approx = true} : vector<4x1xf32> -> vector<4x1xf32>
    %151 = vector.broadcast %150 : vector<4x1xf32> to vector<4x4xf32>
    %152 = arith.mulf %147, %151 : vector<4x4xf32>
    %153 = vector.extract_strided_slice %17 {offsets = [0, 12], sizes = [4, 4], strides = [1, 1]} : vector<4x32xf32> to vector<4x4xf32>
    %cst_44 = arith.constant dense<0.000000e+00> : vector<4x4xf32>
    %154 = tpu.matmul %152, %153, %cst_44 {dimension_numbers = #tpu.dot_dimension_numbers<[1], [0], [0], [1], [0, 0, 1, 1], [], []>} : vector<4x4xf32>, vector<4x4xf32>, vector<4x4xf32> -> vector<4x4xf32>
    %155 = vector.extract_strided_slice %20 {offsets = [0, 12], sizes = [4, 4], strides = [1, 1]} : vector<4x32xf32> to vector<4x4xf32>
    %156 = vector.extract_strided_slice %21 {offsets = [0, 12], sizes = [4, 4], strides = [1, 1]} : vector<4x32xf32> to vector<4x4xf32>
    %157 = tpu.transpose %156, [1, 0] : vector<4x4xf32> -> vector<4x4xf32>
    %cst_45 = arith.constant dense<0.000000e+00> : vector<4x4xf32>
    %158 = tpu.matmul %155, %157, %cst_45 {dimension_numbers = #tpu.dot_dimension_numbers<[1], [0], [0], [1], [0, 0, 1, 1], [], []>} : vector<4x4xf32>, vector<4x4xf32>, vector<4x4xf32> -> vector<4x4xf32>
    %cst_46 = arith.constant dense<0xFF800000> : vector<4xf32>
    %159 = vector.multi_reduction <maximumf>, %158, %cst_46 [1] : vector<4x4xf32> to vector<4xf32>
    %160 = vector.shape_cast %159 : vector<4xf32> to vector<4x1xf32>
    %161 = vector.broadcast %160 : vector<4x1xf32> to vector<4x4xf32>
    %162 = arith.subf %158, %161 : vector<4x4xf32>
    %163 = math.exp %162 : vector<4x4xf32>
    %cst_47 = arith.constant dense<0.000000e+00> : vector<4xf32>
    %164 = vector.multi_reduction <add>, %163, %cst_47 [1] : vector<4x4xf32> to vector<4xf32>
    %165 = vector.shape_cast %164 : vector<4xf32> to vector<4x1xf32>
    %166 = tpu.reciprocal %165 {approx = true} : vector<4x1xf32> -> vector<4x1xf32>
    %167 = vector.broadcast %166 : vector<4x1xf32> to vector<4x4xf32>
    %168 = arith.mulf %163, %167 : vector<4x4xf32>
    %cst_48 = arith.constant dense<0.000000e+00> : vector<4xf32>
    %169 = vector.multi_reduction <add>, %168, %cst_48 [1] : vector<4x4xf32> to vector<4xf32>
    %170 = vector.shape_cast %169 : vector<4xf32> to vector<4x1xf32>
    %171 = vector.shape_cast %154 : vector<4x4xf32> to vector<4x1x4xf32>
    %172 = vector.shape_cast %170 : vector<4x1xf32> to vector<1x4x1xf32>
    %173 = vector.broadcast %171 : vector<4x1x4xf32> to vector<4x4x4xf32>
    %174 = vector.broadcast %172 : vector<1x4x1xf32> to vector<4x4x4xf32>
    %175 = arith.mulf %173, %174 : vector<4x4x4xf32>
    %176 = vector.shape_cast %175 : vector<4x4x4xf32> to vector<16x4xf32>
    %c0_49 = arith.constant 0 : index
    %c12 = arith.constant 12 : index
    %177 = vector.load %arg6[%c0_49, %c12] : memref<16x32xf32, #tpu.memory_space<vmem>>, vector<16x4xf32>
    tpu.vector_store %arg6[%c0_49, %c12], %176 {strides = array<i32>} : memref<16x32xf32, #tpu.memory_space<vmem>>, vector<16x4xf32>,
    %178 = vector.extract_strided_slice %15 {offsets = [0, 16], sizes = [4, 4], strides = [1, 1]} : vector<4x32xf32> to vector<4x4xf32>
    %179 = vector.extract_strided_slice %16 {offsets = [0, 16], sizes = [4, 4], strides = [1, 1]} : vector<4x32xf32> to vector<4x4xf32>
    %180 = tpu.transpose %179, [1, 0] : vector<4x4xf32> -> vector<4x4xf32>
    %cst_50 = arith.constant dense<0.000000e+00> : vector<4x4xf32>
    %181 = tpu.matmul %178, %180, %cst_50 {dimension_numbers = #tpu.dot_dimension_numbers<[1], [0], [0], [1], [0, 0, 1, 1], [], []>} : vector<4x4xf32>, vector<4x4xf32>, vector<4x4xf32> -> vector<4x4xf32>
    %cst_51 = arith.constant dense<0xFF800000> : vector<4xf32>
    %182 = vector.multi_reduction <maximumf>, %181, %cst_51 [1] : vector<4x4xf32> to vector<4xf32>
    %183 = vector.shape_cast %182 : vector<4xf32> to vector<4x1xf32>
    %184 = vector.broadcast %183 : vector<4x1xf32> to vector<4x4xf32>
    %185 = arith.subf %181, %184 : vector<4x4xf32>
    %186 = math.exp %185 : vector<4x4xf32>
    %cst_52 = arith.constant dense<0.000000e+00> : vector<4xf32>
    %187 = vector.multi_reduction <add>, %186, %cst_52 [1] : vector<4x4xf32> to vector<4xf32>
    %188 = vector.shape_cast %187 : vector<4xf32> to vector<4x1xf32>
    %189 = tpu.reciprocal %188 {approx = true} : vector<4x1xf32> -> vector<4x1xf32>
    %190 = vector.broadcast %189 : vector<4x1xf32> to vector<4x4xf32>
    %191 = arith.mulf %186, %190 : vector<4x4xf32>
    %192 = vector.extract_strided_slice %17 {offsets = [0, 16], sizes = [4, 4], strides = [1, 1]} : vector<4x32xf32> to vector<4x4xf32>
    %cst_53 = arith.constant dense<0.000000e+00> : vector<4x4xf32>
    %193 = tpu.matmul %191, %192, %cst_53 {dimension_numbers = #tpu.dot_dimension_numbers<[1], [0], [0], [1], [0, 0, 1, 1], [], []>} : vector<4x4xf32>, vector<4x4xf32>, vector<4x4xf32> -> vector<4x4xf32>
    %194 = vector.extract_strided_slice %20 {offsets = [0, 16], sizes = [4, 4], strides = [1, 1]} : vector<4x32xf32> to vector<4x4xf32>
    %195 = vector.extract_strided_slice %21 {offsets = [0, 16], sizes = [4, 4], strides = [1, 1]} : vector<4x32xf32> to vector<4x4xf32>
    %196 = tpu.transpose %195, [1, 0] : vector<4x4xf32> -> vector<4x4xf32>
    %cst_54 = arith.constant dense<0.000000e+00> : vector<4x4xf32>
    %197 = tpu.matmul %194, %196, %cst_54 {dimension_numbers = #tpu.dot_dimension_numbers<[1], [0], [0], [1], [0, 0, 1, 1], [], []>} : vector<4x4xf32>, vector<4x4xf32>, vector<4x4xf32> -> vector<4x4xf32>
    %cst_55 = arith.constant dense<0xFF800000> : vector<4xf32>
    %198 = vector.multi_reduction <maximumf>, %197, %cst_55 [1] : vector<4x4xf32> to vector<4xf32>
    %199 = vector.shape_cast %198 : vector<4xf32> to vector<4x1xf32>
    %200 = vector.broadcast %199 : vector<4x1xf32> to vector<4x4xf32>
    %201 = arith.subf %197, %200 : vector<4x4xf32>
    %202 = math.exp %201 : vector<4x4xf32>
    %cst_56 = arith.constant dense<0.000000e+00> : vector<4xf32>
    %203 = vector.multi_reduction <add>, %202, %cst_56 [1] : vector<4x4xf32> to vector<4xf32>
    %204 = vector.shape_cast %203 : vector<4xf32> to vector<4x1xf32>
    %205 = tpu.reciprocal %204 {approx = true} : vector<4x1xf32> -> vector<4x1xf32>
    %206 = vector.broadcast %205 : vector<4x1xf32> to vector<4x4xf32>
    %207 = arith.mulf %202, %206 : vector<4x4xf32>
    %cst_57 = arith.constant dense<0.000000e+00> : vector<4xf32>
    %208 = vector.multi_reduction <add>, %207, %cst_57 [1] : vector<4x4xf32> to vector<4xf32>
    %209 = vector.shape_cast %208 : vector<4xf32> to vector<4x1xf32>
    %210 = vector.shape_cast %193 : vector<4x4xf32> to vector<4x1x4xf32>
    %211 = vector.shape_cast %209 : vector<4x1xf32> to vector<1x4x1xf32>
    %212 = vector.broadcast %210 : vector<4x1x4xf32> to vector<4x4x4xf32>
    %213 = vector.broadcast %211 : vector<1x4x1xf32> to vector<4x4x4xf32>
    %214 = arith.mulf %212, %213 : vector<4x4x4xf32>
    %215 = vector.shape_cast %214 : vector<4x4x4xf32> to vector<16x4xf32>
    %c0_58 = arith.constant 0 : index
    %c16 = arith.constant 16 : index
    %216 = vector.load %arg6[%c0_58, %c16] : memref<16x32xf32, #tpu.memory_space<vmem>>, vector<16x4xf32>
    tpu.vector_store %arg6[%c0_58, %c16], %215 {strides = array<i32>} : memref<16x32xf32, #tpu.memory_space<vmem>>, vector<16x4xf32>,
    %217 = vector.extract_strided_slice %15 {offsets = [0, 20], sizes = [4, 4], strides = [1, 1]} : vector<4x32xf32> to vector<4x4xf32>
    %218 = vector.extract_strided_slice %16 {offsets = [0, 20], sizes = [4, 4], strides = [1, 1]} : vector<4x32xf32> to vector<4x4xf32>
    %219 = tpu.transpose %218, [1, 0] : vector<4x4xf32> -> vector<4x4xf32>
    %cst_59 = arith.constant dense<0.000000e+00> : vector<4x4xf32>
    %220 = tpu.matmul %217, %219, %cst_59 {dimension_numbers = #tpu.dot_dimension_numbers<[1], [0], [0], [1], [0, 0, 1, 1], [], []>} : vector<4x4xf32>, vector<4x4xf32>, vector<4x4xf32> -> vector<4x4xf32>
    %cst_60 = arith.constant dense<0xFF800000> : vector<4xf32>
    %221 = vector.multi_reduction <maximumf>, %220, %cst_60 [1] : vector<4x4xf32> to vector<4xf32>
    %222 = vector.shape_cast %221 : vector<4xf32> to vector<4x1xf32>
    %223 = vector.broadcast %222 : vector<4x1xf32> to vector<4x4xf32>
    %224 = arith.subf %220, %223 : vector<4x4xf32>
    %225 = math.exp %224 : vector<4x4xf32>
    %cst_61 = arith.constant dense<0.000000e+00> : vector<4xf32>
    %226 = vector.multi_reduction <add>, %225, %cst_61 [1] : vector<4x4xf32> to vector<4xf32>
    %227 = vector.shape_cast %226 : vector<4xf32> to vector<4x1xf32>
    %228 = tpu.reciprocal %227 {approx = true} : vector<4x1xf32> -> vector<4x1xf32>
    %229 = vector.broadcast %228 : vector<4x1xf32> to vector<4x4xf32>
    %230 = arith.mulf %225, %229 : vector<4x4xf32>
    %231 = vector.extract_strided_slice %17 {offsets = [0, 20], sizes = [4, 4], strides = [1, 1]} : vector<4x32xf32> to vector<4x4xf32>
    %cst_62 = arith.constant dense<0.000000e+00> : vector<4x4xf32>
    %232 = tpu.matmul %230, %231, %cst_62 {dimension_numbers = #tpu.dot_dimension_numbers<[1], [0], [0], [1], [0, 0, 1, 1], [], []>} : vector<4x4xf32>, vector<4x4xf32>, vector<4x4xf32> -> vector<4x4xf32>
    %233 = vector.extract_strided_slice %20 {offsets = [0, 20], sizes = [4, 4], strides = [1, 1]} : vector<4x32xf32> to vector<4x4xf32>
    %234 = vector.extract_strided_slice %21 {offsets = [0, 20], sizes = [4, 4], strides = [1, 1]} : vector<4x32xf32> to vector<4x4xf32>
    %235 = tpu.transpose %234, [1, 0] : vector<4x4xf32> -> vector<4x4xf32>
    %cst_63 = arith.constant dense<0.000000e+00> : vector<4x4xf32>
    %236 = tpu.matmul %233, %235, %cst_63 {dimension_numbers = #tpu.dot_dimension_numbers<[1], [0], [0], [1], [0, 0, 1, 1], [], []>} : vector<4x4xf32>, vector<4x4xf32>, vector<4x4xf32> -> vector<4x4xf32>
    %cst_64 = arith.constant dense<0xFF800000> : vector<4xf32>
    %237 = vector.multi_reduction <maximumf>, %236, %cst_64 [1] : vector<4x4xf32> to vector<4xf32>
    %238 = vector.shape_cast %237 : vector<4xf32> to vector<4x1xf32>
    %239 = vector.broadcast %238 : vector<4x1xf32> to vector<4x4xf32>
    %240 = arith.subf %236, %239 : vector<4x4xf32>
    %241 = math.exp %240 : vector<4x4xf32>
    %cst_65 = arith.constant dense<0.000000e+00> : vector<4xf32>
    %242 = vector.multi_reduction <add>, %241, %cst_65 [1] : vector<4x4xf32> to vector<4xf32>
    %243 = vector.shape_cast %242 : vector<4xf32> to vector<4x1xf32>
    %244 = tpu.reciprocal %243 {approx = true} : vector<4x1xf32> -> vector<4x1xf32>
    %245 = vector.broadcast %244 : vector<4x1xf32> to vector<4x4xf32>
    %246 = arith.mulf %241, %245 : vector<4x4xf32>
    %cst_66 = arith.constant dense<0.000000e+00> : vector<4xf32>
    %247 = vector.multi_reduction <add>, %246, %cst_66 [1] : vector<4x4xf32> to vector<4xf32>
    %248 = vector.shape_cast %247 : vector<4xf32> to vector<4x1xf32>
    %249 = vector.shape_cast %232 : vector<4x4xf32> to vector<4x1x4xf32>
    %250 = vector.shape_cast %248 : vector<4x1xf32> to vector<1x4x1xf32>
    %251 = vector.broadcast %249 : vector<4x1x4xf32> to vector<4x4x4xf32>
    %252 = vector.broadcast %250 : vector<1x4x1xf32> to vector<4x4x4xf32>
    %253 = arith.mulf %251, %252 : vector<4x4x4xf32>
    %254 = vector.shape_cast %253 : vector<4x4x4xf32> to vector<16x4xf32>
    %c0_67 = arith.constant 0 : index
    %c20 = arith.constant 20 : index
    %255 = vector.load %arg6[%c0_67, %c20] : memref<16x32xf32, #tpu.memory_space<vmem>>, vector<16x4xf32>
    tpu.vector_store %arg6[%c0_67, %c20], %254 {strides = array<i32>} : memref<16x32xf32, #tpu.memory_space<vmem>>, vector<16x4xf32>,
    %256 = vector.extract_strided_slice %15 {offsets = [0, 24], sizes = [4, 4], strides = [1, 1]} : vector<4x32xf32> to vector<4x4xf32>
    %257 = vector.extract_strided_slice %16 {offsets = [0, 24], sizes = [4, 4], strides = [1, 1]} : vector<4x32xf32> to vector<4x4xf32>
    %258 = tpu.transpose %257, [1, 0] : vector<4x4xf32> -> vector<4x4xf32>
    %cst_68 = arith.constant dense<0.000000e+00> : vector<4x4xf32>
    %259 = tpu.matmul %256, %258, %cst_68 {dimension_numbers = #tpu.dot_dimension_numbers<[1], [0], [0], [1], [0, 0, 1, 1], [], []>} : vector<4x4xf32>, vector<4x4xf32>, vector<4x4xf32> -> vector<4x4xf32>
    %cst_69 = arith.constant dense<0xFF800000> : vector<4xf32>
    %260 = vector.multi_reduction <maximumf>, %259, %cst_69 [1] : vector<4x4xf32> to vector<4xf32>
    %261 = vector.shape_cast %260 : vector<4xf32> to vector<4x1xf32>
    %262 = vector.broadcast %261 : vector<4x1xf32> to vector<4x4xf32>
    %263 = arith.subf %259, %262 : vector<4x4xf32>
    %264 = math.exp %263 : vector<4x4xf32>
    %cst_70 = arith.constant dense<0.000000e+00> : vector<4xf32>
    %265 = vector.multi_reduction <add>, %264, %cst_70 [1] : vector<4x4xf32> to vector<4xf32>
    %266 = vector.shape_cast %265 : vector<4xf32> to vector<4x1xf32>
    %267 = tpu.reciprocal %266 {approx = true} : vector<4x1xf32> -> vector<4x1xf32>
    %268 = vector.broadcast %267 : vector<4x1xf32> to vector<4x4xf32>
    %269 = arith.mulf %264, %268 : vector<4x4xf32>
    %270 = vector.extract_strided_slice %17 {offsets = [0, 24], sizes = [4, 4], strides = [1, 1]} : vector<4x32xf32> to vector<4x4xf32>
    %cst_71 = arith.constant dense<0.000000e+00> : vector<4x4xf32>
    %271 = tpu.matmul %269, %270, %cst_71 {dimension_numbers = #tpu.dot_dimension_numbers<[1], [0], [0], [1], [0, 0, 1, 1], [], []>} : vector<4x4xf32>, vector<4x4xf32>, vector<4x4xf32> -> vector<4x4xf32>
    %272 = vector.extract_strided_slice %20 {offsets = [0, 24], sizes = [4, 4], strides = [1, 1]} : vector<4x32xf32> to vector<4x4xf32>
    %273 = vector.extract_strided_slice %21 {offsets = [0, 24], sizes = [4, 4], strides = [1, 1]} : vector<4x32xf32> to vector<4x4xf32>
    %274 = tpu.transpose %273, [1, 0] : vector<4x4xf32> -> vector<4x4xf32>
    %cst_72 = arith.constant dense<0.000000e+00> : vector<4x4xf32>
    %275 = tpu.matmul %272, %274, %cst_72 {dimension_numbers = #tpu.dot_dimension_numbers<[1], [0], [0], [1], [0, 0, 1, 1], [], []>} : vector<4x4xf32>, vector<4x4xf32>, vector<4x4xf32> -> vector<4x4xf32>
    %cst_73 = arith.constant dense<0xFF800000> : vector<4xf32>
    %276 = vector.multi_reduction <maximumf>, %275, %cst_73 [1] : vector<4x4xf32> to vector<4xf32>
    %277 = vector.shape_cast %276 : vector<4xf32> to vector<4x1xf32>
    %278 = vector.broadcast %277 : vector<4x1xf32> to vector<4x4xf32>
    %279 = arith.subf %275, %278 : vector<4x4xf32>
    %280 = math.exp %279 : vector<4x4xf32>
    %cst_74 = arith.constant dense<0.000000e+00> : vector<4xf32>
    %281 = vector.multi_reduction <add>, %280, %cst_74 [1] : vector<4x4xf32> to vector<4xf32>
    %282 = vector.shape_cast %281 : vector<4xf32> to vector<4x1xf32>
    %283 = tpu.reciprocal %282 {approx = true} : vector<4x1xf32> -> vector<4x1xf32>
    %284 = vector.broadcast %283 : vector<4x1xf32> to vector<4x4xf32>
    %285 = arith.mulf %280, %284 : vector<4x4xf32>
    %cst_75 = arith.constant dense<0.000000e+00> : vector<4xf32>
    %286 = vector.multi_reduction <add>, %285, %cst_75 [1] : vector<4x4xf32> to vector<4xf32>
    %287 = vector.shape_cast %286 : vector<4xf32> to vector<4x1xf32>
    %288 = vector.shape_cast %271 : vector<4x4xf32> to vector<4x1x4xf32>
    %289 = vector.shape_cast %287 : vector<4x1xf32> to vector<1x4x1xf32>
    %290 = vector.broadcast %288 : vector<4x1x4xf32> to vector<4x4x4xf32>
    %291 = vector.broadcast %289 : vector<1x4x1xf32> to vector<4x4x4xf32>
    %292 = arith.mulf %290, %291 : vector<4x4x4xf32>
    %293 = vector.shape_cast %292 : vector<4x4x4xf32> to vector<16x4xf32>
    %c0_76 = arith.constant 0 : index
    %c24 = arith.constant 24 : index
    %294 = vector.load %arg6[%c0_76, %c24] : memref<16x32xf32, #tpu.memory_space<vmem>>, vector<16x4xf32>
    tpu.vector_store %arg6[%c0_76, %c24], %293 {strides = array<i32>} : memref<16x32xf32, #tpu.memory_space<vmem>>, vector<16x4xf32>,
    %295 = vector.extract_strided_slice %15 {offsets = [0, 28], sizes = [4, 4], strides = [1, 1]} : vector<4x32xf32> to vector<4x4xf32>
    %296 = vector.extract_strided_slice %16 {offsets = [0, 28], sizes = [4, 4], strides = [1, 1]} : vector<4x32xf32> to vector<4x4xf32>
    %297 = tpu.transpose %296, [1, 0] : vector<4x4xf32> -> vector<4x4xf32>
    %cst_77 = arith.constant dense<0.000000e+00> : vector<4x4xf32>
    %298 = tpu.matmul %295, %297, %cst_77 {dimension_numbers = #tpu.dot_dimension_numbers<[1], [0], [0], [1], [0, 0, 1, 1], [], []>} : vector<4x4xf32>, vector<4x4xf32>, vector<4x4xf32> -> vector<4x4xf32>
    %cst_78 = arith.constant dense<0xFF800000> : vector<4xf32>
    %299 = vector.multi_reduction <maximumf>, %298, %cst_78 [1] : vector<4x4xf32> to vector<4xf32>
    %300 = vector.shape_cast %299 : vector<4xf32> to vector<4x1xf32>
    %301 = vector.broadcast %300 : vector<4x1xf32> to vector<4x4xf32>
    %302 = arith.subf %298, %301 : vector<4x4xf32>
    %303 = math.exp %302 : vector<4x4xf32>
    %cst_79 = arith.constant dense<0.000000e+00> : vector<4xf32>
    %304 = vector.multi_reduction <add>, %303, %cst_79 [1] : vector<4x4xf32> to vector<4xf32>
    %305 = vector.shape_cast %304 : vector<4xf32> to vector<4x1xf32>
    %306 = tpu.reciprocal %305 {approx = true} : vector<4x1xf32> -> vector<4x1xf32>
    %307 = vector.broadcast %306 : vector<4x1xf32> to vector<4x4xf32>
    %308 = arith.mulf %303, %307 : vector<4x4xf32>
    %309 = vector.extract_strided_slice %17 {offsets = [0, 28], sizes = [4, 4], strides = [1, 1]} : vector<4x32xf32> to vector<4x4xf32>
    %cst_80 = arith.constant dense<0.000000e+00> : vector<4x4xf32>
    %310 = tpu.matmul %308, %309, %cst_80 {dimension_numbers = #tpu.dot_dimension_numbers<[1], [0], [0], [1], [0, 0, 1, 1], [], []>} : vector<4x4xf32>, vector<4x4xf32>, vector<4x4xf32> -> vector<4x4xf32>
    %311 = vector.extract_strided_slice %20 {offsets = [0, 28], sizes = [4, 4], strides = [1, 1]} : vector<4x32xf32> to vector<4x4xf32>
    %312 = vector.extract_strided_slice %21 {offsets = [0, 28], sizes = [4, 4], strides = [1, 1]} : vector<4x32xf32> to vector<4x4xf32>
    %313 = tpu.transpose %312, [1, 0] : vector<4x4xf32> -> vector<4x4xf32>
    %cst_81 = arith.constant dense<0.000000e+00> : vector<4x4xf32>
    %314 = tpu.matmul %311, %313, %cst_81 {dimension_numbers = #tpu.dot_dimension_numbers<[1], [0], [0], [1], [0, 0, 1, 1], [], []>} : vector<4x4xf32>, vector<4x4xf32>, vector<4x4xf32> -> vector<4x4xf32>
    %cst_82 = arith.constant dense<0xFF800000> : vector<4xf32>
    %315 = vector.multi_reduction <maximumf>, %314, %cst_82 [1] : vector<4x4xf32> to vector<4xf32>
    %316 = vector.shape_cast %315 : vector<4xf32> to vector<4x1xf32>
    %317 = vector.broadcast %316 : vector<4x1xf32> to vector<4x4xf32>
    %318 = arith.subf %314, %317 : vector<4x4xf32>
    %319 = math.exp %318 : vector<4x4xf32>
    %cst_83 = arith.constant dense<0.000000e+00> : vector<4xf32>
    %320 = vector.multi_reduction <add>, %319, %cst_83 [1] : vector<4x4xf32> to vector<4xf32>
    %321 = vector.shape_cast %320 : vector<4xf32> to vector<4x1xf32>
    %322 = tpu.reciprocal %321 {approx = true} : vector<4x1xf32> -> vector<4x1xf32>
    %323 = vector.broadcast %322 : vector<4x1xf32> to vector<4x4xf32>
    %324 = arith.mulf %319, %323 : vector<4x4xf32>
    %cst_84 = arith.constant dense<0.000000e+00> : vector<4xf32>
    %325 = vector.multi_reduction <add>, %324, %cst_84 [1] : vector<4x4xf32> to vector<4xf32>
    %326 = vector.shape_cast %325 : vector<4xf32> to vector<4x1xf32>
    %327 = vector.shape_cast %310 : vector<4x4xf32> to vector<4x1x4xf32>
    %328 = vector.shape_cast %326 : vector<4x1xf32> to vector<1x4x1xf32>
    %329 = vector.broadcast %327 : vector<4x1x4xf32> to vector<4x4x4xf32>
    %330 = vector.broadcast %328 : vector<1x4x1xf32> to vector<4x4x4xf32>
    %331 = arith.mulf %329, %330 : vector<4x4x4xf32>
    %332 = vector.shape_cast %331 : vector<4x4x4xf32> to vector<16x4xf32>
    %c0_85 = arith.constant 0 : index
    %c28 = arith.constant 28 : index
    %333 = vector.load %arg6[%c0_85, %c28] : memref<16x32xf32, #tpu.memory_space<vmem>>, vector<16x4xf32>
    tpu.vector_store %arg6[%c0_85, %c28], %332 {strides = array<i32>} : memref<16x32xf32, #tpu.memory_space<vmem>>, vector<16x4xf32>,
    %c0_86 = arith.constant 0 : index
    %c0_87 = arith.constant 0 : index
    %334 = vector.load %arg6[%c0_86, %c0_87] : memref<16x32xf32, #tpu.memory_space<vmem>>, vector<16x32xf32>
    %c0_88 = arith.constant 0 : index
    %c0_89 = arith.constant 0 : index
    %335 = vector.load %arg3[%c0_88, %c0_89] : memref<32x32xf32, #tpu.memory_space<vmem>>, vector<32x32xf32>
    %cst_90 = arith.constant dense<0.000000e+00> : vector<16x32xf32>
    %336 = tpu.matmul %334, %335, %cst_90 {dimension_numbers = #tpu.dot_dimension_numbers<[1], [0], [0], [1], [0, 0, 1, 1], [], []>} : vector<16x32xf32>, vector<32x32xf32>, vector<16x32xf32> -> vector<16x32xf32>
    %c0_91 = arith.constant 0 : index
    %c0_92 = arith.constant 0 : index
    %337 = vector.load %arg4[%c0_91, %c0_92] : memref<1x32xf32, #tpu.memory_space<vmem>>, vector<1x32xf32>
    %338 = vector.broadcast %337 : vector<1x32xf32> to vector<16x32xf32>
    %339 = arith.addf %336, %338 : vector<16x32xf32>
    %c0_93 = arith.constant 0 : index
    %c0_94 = arith.constant 0 : index
    %c0_95 = arith.constant 0 : index
    %340 = vector.load %arg5[%c0_93, %c0_94, %c0_95] : memref<1x16x32xf32, #tpu.memory_space<vmem>>, vector<1x16x32xf32>
    %341 = vector.shape_cast %340 : vector<1x16x32xf32> to vector<16x32xf32>
    %342 = vector.shape_cast %339 : vector<16x32xf32> to vector<1x16x32xf32>
    tpu.vector_store %arg5[%c0_93, %c0_94, %c0_95], %342 {strides = array<i32>} : memref<1x16x32xf32, #tpu.memory_space<vmem>>, vector<1x16x32xf32>,
    return
  }
  func.func @transform_0(%arg0: i32) -> (i32, i32, i32) {
    %c0_i32 = arith.constant 0 : i32
    %c0_i32_0 = arith.constant 0 : i32
    %c0_i32_1 = arith.constant 0 : i32
    return %arg0, %c0_i32, %c0_i32_0 : i32, i32, i32
  }
  func.func @transform_1(%arg0: i32) -> (i32, i32) {
    %c0_i32 = arith.constant 0 : i32
    %c0_i32_0 = arith.constant 0 : i32
    %c0_i32_1 = arith.constant 0 : i32
    return %c0_i32, %c0_i32_0 : i32, i32
  }
  func.func @transform_2(%arg0: i32) -> (i32, i32) {
    %c0_i32 = arith.constant 0 : i32
    %c0_i32_0 = arith.constant 0 : i32
    %c0_i32_1 = arith.constant 0 : i32
    return %c0_i32, %c0_i32_0 : i32, i32
  }
  func.func @transform_3(%arg0: i32) -> (i32, i32) {
    %c0_i32 = arith.constant 0 : i32
    %c0_i32_0 = arith.constant 0 : i32
    %c0_i32_1 = arith.constant 0 : i32
    return %c0_i32, %c0_i32_0 : i32, i32
  }
  func.func @transform_4(%arg0: i32) -> (i32, i32, i32) {
    %c0_i32 = arith.constant 0 : i32
    %c0_i32_0 = arith.constant 0 : i32
    %c0_i32_1 = arith.constant 0 : i32
    return %arg0, %c0_i32, %c0_i32_0 : i32, i32, i32
  }
}

</mosaic_0001>

<bundles_post_ra>
// kernel: tpu_custom_call.1
= control target key start
LH: loop header
LB: loop body
LE: loop exit
PB: predicated region body
PF: predicated region fallthrough
CT: control target
= control target key end

     0   :  { %9 = vsyncpa [#allocation4], 0  ;;  %s4556_s0 = inlined_call_operand.hbm [shape: f32[2,16,32], index: 0, kind: input, shape index: {}]   ;;  %s4557_s1 = inlined_call_operand.hbm [shape: f32[32,96], index: 1, kind: input, shape index: {}]   ;;  %s4558_s2 = inlined_call_operand.hbm [shape: f32[32,32], index: 2, kind: input, shape index: {}]   ;;  %s4559_s3 = inlined_call_operand.vmem [shape: f32[1,32], index: 3, kind: input, shape index: {}]   ;;  %s4560_s4 = inlined_call_operand.hbm [shape: f32[2,16,32], index: 4, kind: output, shape index: {}]  }
   0x1   :  { %11 = vsyncpa [#allocation4 + $0x1], 0 }
   0x2   :  { %12 = vsyncpa [#allocation7], 0 }
   0x3   :  { %13 = vsyncpa [#allocation5], 0 }
   0x4   :  { %15 = vsyncpa [#allocation5 + $0x1], 0  ;;  %s3933_s15 = smov 0   ;;  %s3935_s16 = smov 0  }
   0x5   :  { %s3937_s17 = smov 0   ;;  %s3939_s18 = smov 0  }
   0x6 LB: > { %s3954_s19 = sadd.s32 4294967295, %s3865_s18   ;;  %s3229_s20 = sadd.s32 4294967294, %s3865_s18   ;;  %s3865_s18 = sphi %s3939_s18, %s4580_s18   ;;  %s3861_s17 = sphi %s3937_s17, %s4579_s17   ;;  %s3857_s16 = sphi %s3935_s16, %s4578_s16   ;;  %s3853_s15 = sphi %s3933_s15, %s4577_s15  }
   0x7   : > { %p41_p0 = scmp.ne.s32.totalorder %s3857_s16, %s3853_s15  ;;  %p4561_p1 = scmp.eq.s32.totalorder %s3954_s19, 0 }
   0x8   : > { %p134_p3 = scmp.eq.s32.totalorder %s3229_s20, 1  ;;  %p3230_p5 = scmp.ge.s32.totalorder %s3865_s18, 1 }
   0x9   : > { %p3963_p4 = por %p4561_p1, %p41_p0  ;;  %p141_p7 = scmp.lt.s32.totalorder %s3865_s18, 3 }
   0xa   : > { %p3968_p6 = por %p134_p3, %p41_p0  ;;  %s3867_s24 = smov [#allocation6]  }
   0xb   : > { %s4564_s21 = scalar_select %p3963_p4, 1, 0 }
   0xc   : > { %s4565_s22 = scalar_select %p3968_p6, 1, 0 }
   0xd   : > { %p3973_p8 = pnand %p3230_p5, %p141_p7  ;;  %s153_s25 = sshll.u32 %s3867_s24, 4  ;;  %s3977_s25 = int_to_ptr.vmem [resolvable:$true] %s153_s25 }
   0xe   : > { %s3868_s27 = smov [#allocation8]   ;;  %s3709_s5 = scalar_lea.hbm %s4557_s1, 512 }
   0xf   : > { %p3551_p9 = pneg %p3973_p8  ;;  %s166_s28 = sshll.u32 %s3868_s27, 4  ;;  %s3988_s28 = int_to_ptr.vmem [resolvable:$true] %s166_s28 }
  0x10   : > { %p3710_p12 = scmp.ne.s32.totalorder %s4557_s1, %s3709_s5  ;;  %p3716_p5 = scmp.lt.u32.totalorder %s3709_s5, %s4557_s1 }
  0x11   : > { %p3984_p11 = pnand %p3551_p9, %p4561_p1 }
  0x13   : > { %p3711_p13 = pneg %p3984_p11 }
  0x15   : > { %p3712_p0 = pnand %p3711_p13, %p3710_p12 }
  0x17   : > { %p3713_p3 = pneg %p3712_p0 }
  0x19   : > { %p3718_p7 = pnand %p3716_p5, %p3713_p3 }
  0x1b   : > { %3721 = shalt.err (!%p3718_p7)
}
  0x1c   : > { %s3722_s10 = scalar_lea.vmem %s3977_s25, 512  ;;  %p3730_p2 = scmp.lt.s32.totalorder %s3977_s25, %s3977_s25 }
  0x1d   : > { %p3723_p9 = scmp.ne.s32.totalorder %s3977_s25, %s3722_s10  ;;  %p3731_p12 = scmp.lt.s32.totalorder %s3722_s10, %s3722_s10 }
  0x1f   : > { %p3725_p10 = pnand %p3723_p9, %p3711_p13  ;;  %p3732_p0 = por %p3731_p12, %p3730_p2 }
  0x21   : > { %p3726_p1 = pneg %p3725_p10 }
  0x23   : > { %p3733_p6 = pnand %p3732_p0, %p3726_p1 }
  0x25   : > { %3736 = shalt.err (!%p3733_p6)
}
  0x26   : > { %s3869_s11 = smov 128   ;;  %s3870_s12 = smov 8  }
  0x27   : > { %3554 = dma.hbm_to_vmem [thread:$0]  (!%p3984_p11), %s4557_s1, 512, %s3977_s25, [#allocation7], %s3869_s11, %s3869_s11, %s3870_s12  }
  0x28   : > { %s3737_s27 = scalar_lea.hbm %s4558_s2, 512 }
  0x29   : > { %p3738_p1 = scmp.ne.s32.totalorder %s4558_s2, %s3737_s27  ;;  %p3744_p10 = scmp.lt.u32.totalorder %s3737_s27, %s4558_s2 }
  0x2b   : > { %p3740_p2 = pnand %p3738_p1, %p3711_p13 }
  0x2d   : > { %p3741_p6 = pneg %p3740_p2 }
  0x2f   : > { %p3746_p3 = pnand %p3744_p10, %p3741_p6 }
  0x31   : > { %3749 = shalt.err (!%p3746_p3)
}
  0x32   : > { %s3750_s25 = scalar_lea.vmem %s3988_s28, 512  ;;  %p3758_p12 = scmp.lt.s32.totalorder %s3988_s28, %s3988_s28 }
  0x33   : > { %p3751_p5 = scmp.ne.s32.totalorder %s3988_s28, %s3750_s25  ;;  %p3759_p0 = scmp.lt.s32.totalorder %s3750_s25, %s3750_s25 }
  0x35   : > { %p3753_p7 = pnand %p3751_p5, %p3711_p13  ;;  %p3760_p1 = por %p3759_p0, %p3758_p12 }
  0x37   : > { %p3754_p9 = pneg %p3753_p7 }
  0x39   : > { %p3761_p2 = pnand %p3760_p1, %p3754_p9 }
  0x3b   : > { %3764 = shalt.err (!%p3761_p2)
}
  0x3c   : > { %3557 = dma.hbm_to_vmem [thread:$0]  (!%p3984_p11), %s4558_s2, 512, %s3988_s28, [#allocation7], %s3869_s11, %s3869_s11, %s3870_s12  }
  0x3d   : > { %s4049_s26 = sadd.s32 1, %s3865_s18   ;;  %s28_s9 = sadd.s32 1, %s3861_s17 }
  0x3e   : > { %s25_s10 = ssub.s32 %s3865_s18, %s4049_s26  ;;  %p35_p13 = scmp.ne.s32.totalorder %s3861_s17, %s3857_s16 }
  0x3f   : > { %p26_p6 = scmp.eq.s32.totalorder %s25_s10, 0  ;;  %p36_p10 = scmp.eq.s32.totalorder %s3865_s18, 0 }
  0x40   : > { %p4568_p3 = scmp.eq.s32.totalorder %s3954_s19, 1  ;;  %p3568_p7 = scmp.lt.s32.totalorder %s3865_s18, 2 }
  0x41   : > { %s4065_s14 = scalar_select %p26_p6, %s3861_s17, %s28_s9  }
  0x42   : > { %p4059_p5 = por %p4568_p3, %p35_p13  ;;  %p37_p9 = por %p36_p10, %p35_p13 }
  0x43   : > { %s183_s20 = sand.u32 1, %s3861_s17   ;;  %s3300_s28 = sshll.u32 %s3865_s18, 8 }
  0x44   : > { %s4569_s13 = scalar_select %p4059_p5, 1, 0 }
  0x45   : > { %s3234_s24 = sshll.u32 %s183_s20, 4  ;;  %s4072_s30 = scalar_lea.hbm %s4556_s0, %s3300_s28 }
  0x46   : > { %s187_s5 = scalar_lea.vmem [#allocation3], %s3234_s24  ;;  %p4076_p11 = pnand %p3568_p7, %p37_p9 }
  0x47   : > { %s194_s6 = sshll.u32 %s187_s5, 4  ;;  %s4080_s7 = scalar_lea.sflag [#allocation4], %s183_s20  ;;  %s4074_s6 = int_to_ptr.vmem [resolvable:$true] %s194_s6 }
  0x48   : > { %s3765_s8 = scalar_lea.hbm %s4072_s30, 256  ;;  %p3767_p0 = pneg %p4076_p11 }
  0x49   : > { %p3766_p12 = scmp.ne.s32.totalorder %s4072_s30, %s3765_s8  ;;  %s3770_s24 = scalar_lea.hbm %s4556_s0, 512 }
  0x4a   : > { %p3771_p13 = scmp.lt.u32.totalorder %s4072_s30, %s4556_s0  ;;  %p3772_p6 = scmp.lt.u32.totalorder %s3770_s24, %s3765_s8 }
  0x4b   : > { %p3768_p1 = pnand %p3767_p0, %p3766_p12  ;;  %p3774_p3 = scmp.lt.u32.totalorder %s3765_s8, %s4072_s30 }
  0x4c   : > { %p3773_p10 = por %p3772_p6, %p3771_p13 }
  0x4d   : > { %p3769_p2 = pneg %p3768_p1 }
  0x4e   : > { %p3775_p7 = por %p3774_p3, %p3773_p10 }
  0x50   : > { %p3776_p9 = pnand %p3775_p7, %p3769_p2 }
  0x52   : > { %3779 = shalt.err (!%p3776_p9)
}
  0x53   : > { %s3780_s20 = scalar_lea.vmem %s4074_s6, 256  ;;  %s3871_s29 = smov [#allocation3]  }
  0x54   : > { %p3781_p12 = scmp.ne.s32.totalorder %s4074_s6, %s3780_s20  ;;  %s3785_s5 = sshll.u32 %s3871_s29, 4  ;;  %s3786_s5 = int_to_ptr.vmem [resolvable:$false] %s3785_s5 }
  0x55   : > { %s3787_s9 = scalar_lea.vmem %s3786_s5, 512  ;;  %p3788_p4 = scmp.lt.s32.totalorder %s4074_s6, %s3786_s5 }
  0x56   : > { %p3783_p1 = pnand %p3781_p12, %p3767_p0  ;;  %p3789_p13 = scmp.lt.s32.totalorder %s3787_s9, %s3780_s20 }
  0x58   : > { %p3784_p5 = pneg %p3783_p1  ;;  %p3790_p6 = por %p3789_p13, %p3788_p4 }
  0x5a   : > { %p3791_p10 = pnand %p3790_p6, %p3784_p5 }
  0x5c   : > { %3794 = shalt.err (!%p3791_p10)
}
  0x5d   : > { %3561 = dma.hbm_to_vmem [thread:$0]  (!%p4076_p11), %s4072_s30, 256, %s4074_s6, %s4080_s7, %s3869_s11, %s3869_s11, %s3870_s12  }
  0x5e   : > { %206 = sbr.rel (%p3973_p8) target bundleno = 5384 (0x1508), region = 36  ;;  %s4114_s8 = sand.u32 (!%p3973_p8), 1, %s3857_s16  }
  0x5f   : > { %s3238_s10 = sshll.u32 (!%p3973_p8), %s4114_s8, 4  ;;  %s209_s24 = scalar_lea.sflag (!%p3973_p8), [#allocation4], %s4114_s8 }
  0x60   : > { %s212_s25 = scalar_lea.vmem (!%p3973_p8), [#allocation3], %s3238_s10  ;;  %p4571_p4 = scmp.ne.s32.totalorder (!%p3973_p8), %s4564_s21, 0 }
  0x65   : > { %3840 = dma.done.wait (%p4571_p4), %s209_s24, 256  }
  0x66   : > { %3842 = vsyncadd (%p4571_p4), %s209_s24, 4294967040  ;;  %p4572_p5 = scmp.eq.s32.totalorder %s3954_s19, 0 }
  0x68   : > { %3844 = dma.done.wait (%p4572_p5), [#allocation7], 1024   ;;  %p4573_p8 = pmov %p4572_p5 }
  0x69   : > { %v3872_v0 = vmov 0.0|0.0   ;;  %vm3873_vm0 = vmmov 0   ;;  %v3874_v1 = vmov 0.0   ;;  %vm253_vm1 = vcmask 257024   ;;  %v291_v2 = vld [vmem:[#allocation6] sm:$0xff]  ;;  %v292_v3 = vld [vmem:[#allocation6 + $0x8] sm:$0xff] }
  0x6a   : > { %3846 = vsyncadd (%p4573_p8), [#allocation7], 4294966272  ;;  %3519 = vmatprep.subr.bf16.mxu0 %v3872_v0  ;;  %3374 = vmatprep.mubr.msk.f32.mxu0 %vm3873_vm0, %v3874_v1  ;;  %v293_v4 = vld [vmem:[#allocation6 + $0x10] sm:$0xff]  ;;  %v3520_v5 = vpack.c.bf16 %v292_v3, %v291_v2  ;;  %v294_v6 = vld [vmem:[#allocation6 + $0x18] sm:$0xff]  ;;  %vm299_vm2 = vcmask 1041409   ;;  %vm301_vm3 = vcmask 1042434  }
  0x6b   : > { %3525 = vmatprep.subr.bf16.mxu1 %v3872_v0  ;;  %3385 = vmatprep.mubr.msk.f32.mxu1 %vm3873_vm0, %v3874_v1  ;;  %v245_v7 = vld [vmem:[%s212_s25] sm:$0xff]  ;;  %v246_v8 = vld [vmem:[%s212_s25 + $0x8] sm:$0xff]  ;;  %v3523_v12 = vpack.c.bf16 %v294_v6, %v293_v4  ;;  %vm303_vm4 = vcmask 1043459   ;;  %vm305_vm5 = vcmask 261120   ;;  %s3875_s21 = smov 64   ;;  %s3876_s23 = smov 96  }
  0x6c   : > { %v249_v9 = vcombine.high %v245_v7, %v245_v7  ;;  %v250_v10 = vcombine.high %v246_v8, %v246_v8  ;;  %v254_v11 = vsel %vm253_vm1, %v245_v7, 0.0  ;;  %3521 = vmatpush3.bf16.msra.mxu0 %v3520_v5  ;;  %v268_v14 = vsel %vm253_vm1, %v246_v8, 0.0  ;;  %3527 = vmatpush3.bf16.msra.mxu1 %v3520_v5  ;;  %s3877_s11 = smov 92   ;;  %s3878_s12 = smov 60  }
  0x6d   : > { %v255_v13 = vrot.slane %v254_v11, 4  ;;  %3522 = vmatprep.subr.bf16.mxu0 %v3872_v0  ;;  %v269_v16 = vrot.slane %v268_v14, 4  ;;  %3528 = vmatprep.subr.bf16.mxu1 %v3872_v0  ;;  %vm456_vm6 = vcmask 31744   ;;  %vm549_vm7 = vcmask 1043456   ;;  %s3879_s30 = smov 124   ;;  %s3880_s6 = smov 120  }
  0x6e   : > { %v261_v15 = vsel %vm253_vm1, %v249_v9, 0.0  ;;  %v275_v17 = vsel %vm253_vm1, %v250_v10, 0.0  ;;  %vm532_vm8 = vcmask 27648   ;;  %s3881_s7 = smov 88   ;;  %s3882_s28 = smov 56   ;;  %vm1092_vm9 = vcmask 64544  }
  0x6f   : > { %v256_v18 = vadd.f32 %v255_v13, %v254_v11  ;;  %v262_v19 = vrot.slane %v261_v15, 4  ;;  %v276_v20 = vrot.slane %v275_v17, 4  ;;  %v270_v21 = vadd.f32 %v269_v16, %v268_v14  ;;  %s3883_s27 = smov 84   ;;  %s3884_s20 = smov 116  }
  0x70   : > { %3524 = vmatpush3.bf16.msra.mxu0 %v3523_v12  ;;  %3530 = vmatpush3.bf16.msra.mxu1 %v3523_v12  ;;  %v287_v47 = vadd.f32 %v261_v15, %v254_v11  ;;  %s3885_s29 = smov 52   ;;  %s3886_s5 = smov 112   ;;  %vm1414_vm10 = vcmask 97344   ;;  %vm1736_vm11 = vcmask 130144   ;;  %vm2058_vm12 = vcmask 162944  }
  0x71   : > { %v257_v22 = vrot.slane %v256_v18, 2  ;;  %v263_v23 = vadd.f32 %v262_v19, %v261_v15  ;;  %v277_v24 = vadd.f32 %v276_v20, %v275_v17  ;;  %v271_v25 = vrot.slane %v270_v21, 2  ;;  %3388 = vmatprep.subr.mxu1 %v3874_v1  ;;  %3398 = vmatprep.subr.mxu0 %v3874_v1  ;;  %s3887_s9 = smov 80   ;;  %s3888_s24 = smov 48  }
  0x72   : > { %v288_v48 = vadd.f32 %v287_v47, %v268_v14  ;;  %s3889_s25 = smov 108   ;;  %vm2380_vm13 = vcmask 195744   ;;  %vm2702_vm14 = vcmask 228544   ;;  %vm3024_vm15 = vcmask 261344   ;;  %p4574_p0 = scmp.ne.s32.totalorder %s4569_s13, 0 }
  0x73   : > { %v258_v26 = vadd.f32 %v257_v22, %v256_v18  ;;  %v264_v27 = vrot.slane %v263_v23, 2  ;;  %v278_v28 = vrot.slane %v277_v24, 2  ;;  %v272_v29 = vadd.f32 %v271_v25, %v270_v21 }
  0x74   : > { %v289_v49 = vadd.f32 %v288_v48, %v275_v17 }
  0x75   : > { %v259_v30 = vrot.slane %v258_v26, 1  ;;  %v265_v31 = vadd.f32 %v264_v27, %v263_v23  ;;  %v279_v32 = vadd.f32 %v278_v28, %v277_v24  ;;  %v273_v33 = vrot.slane %v272_v29, 1 }
  0x76   : > { %v290_v50 = vmul.f32 0.25, %v289_v49 }
  0x77   : > { %v260_v34 = vadd.f32 %v259_v30, %v258_v26  ;;  %v266_v35 = vrot.slane %v265_v31, 1  ;;  %v280_v36 = vrot.slane %v279_v32, 1  ;;  %v274_v37 = vadd.f32 %v273_v33, %v272_v29 }
  0x78   : > { %3386 = vmatmul.mubr.msk.f32.vlgmr.msra.gmra.mrb[0].mxu1 %vm305_vm5, %v290_v50 }
  0x79   : > { %v267_v38 = vadd.f32 %v266_v35, %v265_v31  ;;  %v281_v39 = vadd.f32 %v280_v36, %v279_v32  ;;  %v283_v40 = vmul.f32 0.25, %v260_v34  ;;  %v285_v41 = vmul.f32 0.25, %v274_v37  ;;  %3390 = vmatprep.mubr.msk.f32.mxu1 %vm3873_vm0, %v3874_v1 }
  0x7b   : > { %v284_v42 = vmul.f32 0.25, %v267_v38  ;;  %v286_v43 = vmul.f32 0.25, %v281_v39 }
  0x7d   : > { %v300_v44 = vsel %vm299_vm2, %v284_v42, %v283_v40 }
  0x7e   : > { %v302_v45 = vsel %vm301_vm3, %v285_v41, %v300_v44 }
  0x7f   : > { %v304_v46 = vsel %vm303_vm4, %v286_v43, %v302_v45 }
  0x80   : > { %3375 = vmatmul.mubr.msk.f32.vlgmr.msra.gmra.mrb[0].mxu0 %vm305_vm5, %v304_v46 }
  0x81   : > { %3400 = vmatprep.mubr.msk.f32.mxu0 %vm3873_vm0, %v3874_v1 }
 0x14b   : > { %v4150_v53 = vpop.f32.mrb[0].mxu1 }
 0x14c   : > { %v3387_v54 = vpop.f32.mrb[1].mxu1  ;;  %v4168_v2 = vmul.f32 0.5, %v4150_v53 }
 0x153   : > { %v4144_v51 = vpop.f32.mrb[0].mxu0 }
 0x154   : > { %544 = vrot.lane.b32.xlu1 %v4144_v51, %s3875_s21  ;;  %454 = vrot.lane.b32.xlu0 %v4144_v51, %s3876_s23  ;;  %v3376_v52 = vpop.f32.mrb[1].mxu0  ;;  %v4154_v56 = vmul.f32 0.5, %v4144_v51  ;;  %s3890_s21 = smov 76  }
 0x158   : > { %775 = vrot.lane.b32.xlu1 %v4144_v51, %s3877_s11 }
 0x1c6   : > { %v455_v55 = vpop.permute.xlu0 %454  ;;  %v545_v57 = vpop.permute.xlu1 %544 }
 0x1c7   : > { %3389 = vmatpush3.xpose.msk.msra.mxu1 %vm456_vm6, %v455_v55 }
 0x1c8   : > { %3393 = vmatprep.subr.mxu1 %v3874_v1 }
 0x1ca   : > { %3391 = vmatmul.mubr.msk.f32.vlgmr.msra.gmra.mrb[2].mxu1 %vm456_vm6, %v4154_v56  ;;  %v776_v6 = vpop.permute.xlu1 %775 }
 0x1cb   : > { %3394 = vmatpush3.msk.msra.mxu1 %vm549_vm7, %v545_v57  ;;  %3395 = vmatprep.mubr.msk.f32.mxu1 %vm3873_vm0, %v3874_v1 }
 0x1cc   : > { %3403 = vmatprep.subr.mxu1 %v3874_v1 }
 0x29d   : > { %v528_v58 = vpop.f32.mrb[2].mxu1 }
 0x29e   : > { %v3392_v59 = vpop.f32.mrb[3].mxu1  ;;  %v533_v60 = vsel %vm532_vm8, %v528_v58, -inf }
 0x29f   : > { %534 = vmax.xlane.f32.xlu0 %v533_v60 }
 0x2b5   : > { %623 = vrot.lane.b32.xlu0 %v4150_v53, %s3876_s23  ;;  %s3891_s23 = smov 44  }
 0x2b9   : > { %862 = vrot.lane.b32.xlu0 %v4144_v51, %s3878_s12  ;;  %s3893_s12 = smov 72  }
 0x32c   : > { %v535_v61 = vpop.xlane.xlu0 %534 }
 0x32d   : > { %v536_v62 = vsub.f32 %v528_v58, %v535_v61 }
 0x32f   : > { %v537_v63 = vmul.f32 1.442695, %v536_v62 }
 0x330   : > { %v624_v0 = vpop.permute.xlu0 %623 }
 0x331   : > { %3645 = vpow2.f32 %v537_v63  ;;  %3399 = vmatpush3.xpose.msk.msra.mxu0 %vm456_vm6, %v624_v0 }
 0x332   : > { %3408 = vmatprep.subr.mxu0 %v3874_v1 }
 0x334   : > { %3401 = vmatmul.mubr.msk.f32.vlgmr.msra.gmra.mrb[2].mxu0 %vm456_vm6, %v4168_v2  ;;  %v863_v3 = vpop.permute.xlu0 %862 }
 0x335   : > { %3409 = vmatpush3.msk.msra.mxu0 %vm549_vm7, %v863_v3  ;;  %3410 = vmatprep.mubr.msk.f32.mxu0 %vm3873_vm0, %v3874_v1 }
 0x336   : > { %3418 = vmatprep.subr.mxu0 %v3874_v1 }
 0x33b   : > { %v3646_v4 = vpop.eup %3645 }
 0x33c   : > { %v539_v5 = vsel %vm532_vm8, %v3646_v4, 0.0 }
 0x33d   : > { %540 = vadd.xlane.f32.xlu1 %v539_v5 }
 0x34e   : > { %773 = vrot.lane.b32.xlu1 %v4154_v56, %s3879_s30 }
 0x3ca   : > { %v541_v7 = vpop.xlane.xlu1 %540 }
 0x3cb   : > { %3647 = vrcp.f32 %v541_v7 }
 0x3ce   : > { %v774_v10 = vpop.permute.xlu1 %773 }
 0x3d5   : > { %v3648_v8 = vpop.eup %3647 }
 0x3d6   : > { %v543_v9 = vmul.f32 %v3648_v8, %v3646_v4 }
 0x3d8   : > { %3396 = vmatmul.mubr.msk.f32.vlgmr.msra.gmra.mrb[4].mxu1 %vm456_vm6, %v543_v9 }
 0x3d9   : > { %3404 = vmatpush3.xpose.msk.msra.mxu1 %vm456_vm6, %v776_v6  ;;  %3405 = vmatprep.mubr.msk.f32.mxu1 %vm3873_vm0, %v3874_v1 }
 0x3da   : > { %3413 = vmatprep.subr.mxu1 %v3874_v1 }
 0x3dc   : > { %3406 = vmatmul.mubr.msk.f32.vlgmr.msra.gmra.mrb[6].mxu1 %vm456_vm6, %v774_v10 }
 0x3dd   : > { %3415 = vmatprep.mubr.msk.f32.mxu1 %vm3873_vm0, %v3874_v1 }
 0x407   : > { %v4188_v11 = vpop.f32.mrb[2].mxu0 }
 0x408   : > { %v3402_v12 = vpop.f32.mrb[3].mxu0 }
 0x4ab   : > { %v4190_v13 = vpop.f32.mrb[4].mxu1 }
 0x4ac   : > { %v3397_v14 = vpop.f32.mrb[5].mxu1 }
 0x4af   : > { %v847_v15 = vpop.f32.mrb[6].mxu1 }
 0x4b0   : > { %v3407_v16 = vpop.f32.mrb[7].mxu1  ;;  %v851_v17 = vsel %vm532_vm8, %v847_v15, -inf }
 0x4b1   : > { %852 = vmax.xlane.f32.xlu1 %v851_v17 }
 0x4c2   : > { %1095 = vrot.lane.b32.xlu1 %v4154_v56, %s3880_s6 }
 0x53e   : > { %v853_v18 = vpop.xlane.xlu1 %852 }
 0x53f   : > { %v854_v19 = vsub.f32 %v847_v15, %v853_v18 }
 0x541   : > { %v855_v20 = vmul.f32 1.442695, %v854_v19 }
 0x542   : > { %v1096_v27 = vpop.permute.xlu1 %1095 }
 0x543   : > { %3649 = vpow2.f32 %v855_v20 }
 0x54d   : > { %v3650_v21 = vpop.eup %3649 }
 0x54e   : > { %v857_v22 = vsel %vm532_vm8, %v3650_v21, 0.0 }
 0x54f   : > { %858 = vadd.xlane.f32.xlu0 %v857_v22 }
 0x565   : > { %1097 = vrot.lane.b32.xlu0 %v4144_v51, %s3881_s7 }
 0x5dc   : > { %v859_v23 = vpop.xlane.xlu0 %858 }
 0x5dd   : > { %3651 = vrcp.f32 %v859_v23 }
 0x5e0   : > { %v1098_v26 = vpop.permute.xlu0 %1097 }
 0x5e7   : > { %v3652_v24 = vpop.eup %3651 }
 0x5e8   : > { %v861_v25 = vmul.f32 %v3652_v24, %v3650_v21 }
 0x5ea   : > { %3411 = vmatmul.mubr.msk.f32.vlgmr.msra.gmra.mrb[4].mxu0 %vm456_vm6, %v861_v25 }
 0x5eb   : > { %3419 = vmatpush3.xpose.msk.msra.mxu0 %vm456_vm6, %v1098_v26  ;;  %3420 = vmatprep.mubr.msk.f32.mxu0 %vm3873_vm0, %v3874_v1 }
 0x5ec   : > { %3428 = vmatprep.subr.mxu0 %v3874_v1 }
 0x5ee   : > { %3421 = vmatmul.mubr.msk.f32.vlgmr.msra.gmra.mrb[6].mxu0 %vm456_vm6, %v1096_v27 }
 0x5ef   : > { %3430 = vmatprep.mubr.msk.f32.mxu0 %vm3873_vm0, %v3874_v1 }
 0x6bd   : > { %v4206_v28 = vpop.f32.mrb[4].mxu0 }
 0x6be   : > { %v3412_v29 = vpop.f32.mrb[5].mxu0 }
 0x6c1   : > { %v1169_v30 = vpop.f32.mrb[6].mxu0 }
 0x6c2   : > { %v3422_v31 = vpop.f32.mrb[7].mxu0  ;;  %v1173_v32 = vsel %vm532_vm8, %v1169_v30, -inf }
 0x6c3   : > { %1174 = vmax.xlane.f32.xlu0 %v1173_v32 }
 0x6d9   : > { %941 = vrot.lane.b32.xlu0 %v4150_v53, %s3877_s11  ;;  %s3892_s11 = smov 104  }
 0x6dd   : > { %1184 = vrot.lane.b32.xlu0 %v4144_v51, %s3882_s28  ;;  %s3897_s28 = smov 36  }
 0x6e1   : > { %1419 = vrot.lane.b32.xlu0 %v4144_v51, %s3883_s27 }
 0x6e5   : > { %1417 = vrot.lane.b32.xlu0 %v4154_v56, %s3884_s20 }
 0x750   : > { %v1175_v33 = vpop.xlane.xlu0 %1174 }
 0x751   : > { %v1176_v34 = vsub.f32 %v1169_v30, %v1175_v33 }
 0x753   : > { %v1177_v35 = vmul.f32 1.442695, %v1176_v34 }
 0x754   : > { %v942_v36 = vpop.permute.xlu0 %941 }
 0x755   : > { %3653 = vpow2.f32 %v1177_v35  ;;  %3414 = vmatpush3.xpose.msk.msra.mxu1 %vm456_vm6, %v942_v36 }
 0x756   : > { %3423 = vmatprep.subr.mxu1 %v3874_v1 }
 0x758   : > { %v1185_v41 = vpop.permute.xlu0 %1184 }
 0x75c   : > { %v1420_v43 = vpop.permute.xlu0 %1419 }
 0x75f   : > { %v3654_v37 = vpop.eup %3653 }
 0x760   : > { %v1179_v38 = vsel %vm532_vm8, %v3654_v37, 0.0  ;;  %v1418_v45 = vpop.permute.xlu0 %1417 }
 0x761   : > { %1180 = vadd.xlane.f32.xlu1 %v1179_v38 }
 0x772   : > { %939 = vrot.lane.b32.xlu1 %v4168_v2, %s3879_s30  ;;  %s3894_s30 = smov 40  }
 0x776   : > { %1261 = vrot.lane.b32.xlu1 %v4168_v2, %s3880_s6  ;;  %s3895_s6 = smov 100  }
 0x7ee   : > { %v1181_v39 = vpop.xlane.xlu1 %1180 }
 0x7ef   : > { %3655 = vrcp.f32 %v1181_v39 }
 0x7f2   : > { %v940_v40 = vpop.permute.xlu1 %939 }
 0x7f3   : > { %3416 = vmatmul.mubr.msk.f32.vlgmr.msra.gmra.mrb[8].mxu1 %vm456_vm6, %v940_v40 }
 0x7f4   : > { %3424 = vmatpush3.msk.msra.mxu1 %vm549_vm7, %v1185_v41  ;;  %3425 = vmatprep.mubr.msk.f32.mxu1 %vm3873_vm0, %v3874_v1 }
 0x7f5   : > { %3433 = vmatprep.subr.mxu1 %v3874_v1 }
 0x7f6   : > { %v1262_v60 = vpop.permute.xlu1 %1261 }
 0x7f9   : > { %v3656_v42 = vpop.eup %3655 }
 0x7fa   : > { %v1183_v44 = vmul.f32 %v3656_v42, %v3654_v37 }
 0x7fc   : > { %3426 = vmatmul.mubr.msk.f32.vlgmr.msra.gmra.mrb[10].mxu1 %vm456_vm6, %v1183_v44 }
 0x7fd   : > { %3434 = vmatpush3.xpose.msk.msra.mxu1 %vm456_vm6, %v1420_v43  ;;  %3435 = vmatprep.mubr.msk.f32.mxu1 %vm3873_vm0, %v3874_v1 }
 0x7fe   : > { %3443 = vmatprep.subr.mxu1 %v3874_v1 }
 0x800   : > { %3436 = vmatmul.mubr.msk.f32.vlgmr.msra.gmra.mrb[12].mxu1 %vm456_vm6, %v1418_v45 }
 0x801   : > { %3445 = vmatprep.mubr.msk.f32.mxu1 %vm3873_vm0, %v3874_v1 }
 0x8c6   : > { %v4236_v46 = vpop.f32.mrb[8].mxu1 }
 0x8c7   : > { %v3417_v47 = vpop.f32.mrb[9].mxu1 }
 0x8cf   : > { %v4238_v48 = vpop.f32.mrb[10].mxu1 }
 0x8d0   : > { %v3427_v49 = vpop.f32.mrb[11].mxu1 }
 0x8d3   : > { %v1491_v50 = vpop.f32.mrb[12].mxu1 }
 0x8d4   : > { %v3437_v52 = vpop.f32.mrb[13].mxu1  ;;  %v1495_v54 = vsel %vm532_vm8, %v1491_v50, -inf }
 0x8d5   : > { %1496 = vmax.xlane.f32.xlu0 %v1495_v54 }
 0x8eb   : > { %1263 = vrot.lane.b32.xlu0 %v4150_v53, %s3881_s7  ;;  %s3896_s7 = smov 68  }
 0x8ef   : > { %1506 = vrot.lane.b32.xlu0 %v4144_v51, %s3885_s29  ;;  %s3901_s29 = smov 12  }
 0x8f3   : > { %1739 = vrot.lane.b32.xlu0 %v4154_v56, %s3886_s5 }
 0x8f7   : > { %1585 = vrot.lane.b32.xlu0 %v4150_v53, %s3883_s27  ;;  %s3899_s27 = smov 4  }
 0x962   : > { %v1497_v55 = vpop.xlane.xlu0 %1496 }
 0x963   : > { %v1498_v57 = vsub.f32 %v1491_v50, %v1497_v55 }
 0x965   : > { %v1499_v58 = vmul.f32 1.442695, %v1498_v57 }
 0x966   : > { %v1264_v59 = vpop.permute.xlu0 %1263 }
 0x967   : > { %3657 = vpow2.f32 %v1499_v58  ;;  %3429 = vmatpush3.xpose.msk.msra.mxu0 %vm456_vm6, %v1264_v59 }
 0x968   : > { %3438 = vmatprep.subr.mxu0 %v3874_v1 }
 0x96a   : > { %3431 = vmatmul.mubr.msk.f32.vlgmr.msra.gmra.mrb[8].mxu0 %vm456_vm6, %v1262_v60  ;;  %v1507_v61 = vpop.permute.xlu0 %1506 }
 0x96b   : > { %3439 = vmatpush3.msk.msra.mxu0 %vm549_vm7, %v1507_v61  ;;  %3440 = vmatprep.mubr.msk.f32.mxu0 %vm3873_vm0, %v3874_v1 }
 0x96c   : > { %3448 = vmatprep.subr.mxu0 %v3874_v1 }
 0x96e   : > { %v1740_v62 = vpop.permute.xlu0 %1739 }
 0x971   : > { %v3658_v63 = vpop.eup %3657 }
 0x972   : > { %v1586_v0 = vpop.permute.xlu0 %1585  ;;  %v1501_v3 = vsel %vm532_vm8, %v3658_v63, 0.0 }
 0x973   : > { %1502 = vadd.xlane.f32.xlu1 %v1501_v3  ;;  %3444 = vmatpush3.xpose.msk.msra.mxu1 %vm456_vm6, %v1586_v0 }
 0x974   : > { %3453 = vmatprep.subr.mxu1 %v3874_v1 }
 0x984   : > { %1741 = vrot.lane.b32.xlu1 %v4144_v51, %s3887_s9 }
 0xa00   : > { %v1503_v4 = vpop.xlane.xlu1 %1502 }
 0xa01   : > { %3659 = vrcp.f32 %v1503_v4 }
 0xa04   : > { %v1742_v7 = vpop.permute.xlu1 %1741 }
 0xa0b   : > { %v3660_v5 = vpop.eup %3659 }
 0xa0c   : > { %v1505_v6 = vmul.f32 %v3660_v5, %v3658_v63 }
 0xa0e   : > { %3441 = vmatmul.mubr.msk.f32.vlgmr.msra.gmra.mrb[10].mxu0 %vm456_vm6, %v1505_v6 }
 0xa0f   : > { %3449 = vmatpush3.xpose.msk.msra.mxu0 %vm456_vm6, %v1742_v7  ;;  %3450 = vmatprep.mubr.msk.f32.mxu0 %vm3873_vm0, %v3874_v1 }
 0xa10   : > { %3458 = vmatprep.subr.mxu0 %v3874_v1 }
 0xa12   : > { %3451 = vmatmul.mubr.msk.f32.vlgmr.msra.gmra.mrb[12].mxu0 %vm456_vm6, %v1740_v62 }
 0xa13   : > { %3460 = vmatprep.mubr.msk.f32.mxu0 %vm3873_vm0, %v3874_v1 }
 0xa3d   : > { %v4268_v8 = vpop.f32.mrb[8].mxu0 }
 0xa3e   : > { %v3432_v9 = vpop.f32.mrb[9].mxu0 }
 0xae1   : > { %v4270_v10 = vpop.f32.mrb[10].mxu0 }
 0xae2   : > { %v3442_v12 = vpop.f32.mrb[11].mxu0 }
 0xae5   : > { %v1813_v14 = vpop.f32.mrb[12].mxu0 }
 0xae6   : > { %v3452_v15 = vpop.f32.mrb[13].mxu0  ;;  %v1817_v16 = vsel %vm532_vm8, %v1813_v14, -inf }
 0xae7   : > { %1818 = vmax.xlane.f32.xlu1 %v1817_v16 }
 0xaf8   : > { %1583 = vrot.lane.b32.xlu1 %v4168_v2, %s3884_s20  ;;  %s3900_s20 = smov 8  }
 0xafc   : > { %1828 = vrot.lane.b32.xlu1 %v4144_v51, %s3888_s24  ;;  %s3904_s24 = smov 24  }
 0xb00   : > { %2061 = vrot.lane.b32.xlu1 %v4154_v56, %s3889_s25 }
 0xb04   : > { %1905 = vrot.lane.b32.xlu1 %v4168_v2, %s3886_s5  ;;  %s3902_s5 = smov 16  }
 0xb74   : > { %v1819_v17 = vpop.xlane.xlu1 %1818 }
 0xb75   : > { %v1820_v18 = vsub.f32 %v1813_v14, %v1819_v17 }
 0xb77   : > { %v1821_v19 = vmul.f32 1.442695, %v1820_v18 }
 0xb78   : > { %v1584_v20 = vpop.permute.xlu1 %1583 }
 0xb79   : > { %3661 = vpow2.f32 %v1821_v19  ;;  %3446 = vmatmul.mubr.msk.f32.vlgmr.msra.gmra.mrb[14].mxu1 %vm456_vm6, %v1584_v20 }
 0xb7a   : > { %3455 = vmatprep.mubr.msk.f32.mxu1 %vm3873_vm0, %v3874_v1 }
 0xb7c   : > { %v1829_v21 = vpop.permute.xlu1 %1828 }
 0xb7d   : > { %3454 = vmatpush3.msk.msra.mxu1 %vm549_vm7, %v1829_v21 }
 0xb7e   : > { %3463 = vmatprep.subr.mxu1 %v3874_v1 }
 0xb80   : > { %v2062_v29 = vpop.permute.xlu1 %2061 }
 0xb83   : > { %v3662_v22 = vpop.eup %3661 }
 0xb84   : > { %v1823_v23 = vsel %vm532_vm8, %v3662_v22, 0.0  ;;  %v1906_v41 = vpop.permute.xlu1 %1905 }
 0xb85   : > { %1824 = vadd.xlane.f32.xlu0 %v1823_v23 }
 0xb9b   : > { %2063 = vrot.lane.b32.xlu0 %v4144_v51, %s3890_s21 }
 0xc12   : > { %v1825_v24 = vpop.xlane.xlu0 %1824 }
 0xc13   : > { %3663 = vrcp.f32 %v1825_v24 }
 0xc16   : > { %v2064_v27 = vpop.permute.xlu0 %2063 }
 0xc1d   : > { %v3664_v25 = vpop.eup %3663 }
 0xc1e   : > { %v1827_v26 = vmul.f32 %v3664_v25, %v3662_v22 }
 0xc20   : > { %3456 = vmatmul.mubr.msk.f32.vlgmr.msra.gmra.mrb[16].mxu1 %vm456_vm6, %v1827_v26 }
 0xc21   : > { %3464 = vmatpush3.xpose.msk.msra.mxu1 %vm456_vm6, %v2064_v27  ;;  %3465 = vmatprep.mubr.msk.f32.mxu1 %vm3873_vm0, %v3874_v1 }
 0xc22   : > { %3473 = vmatprep.subr.mxu1 %v3874_v1 }
 0xc24   : > { %3466 = vmatmul.mubr.msk.f32.vlgmr.msra.gmra.mrb[18].mxu1 %vm456_vm6, %v2062_v29 }
 0xc25   : > { %3475 = vmatprep.mubr.msk.f32.mxu1 %vm3873_vm0, %v3874_v1 }
 0xc4c   : > { %v4295_v30 = vpop.f32.mrb[14].mxu1 }
 0xc4d   : > { %v3447_v31 = vpop.f32.mrb[15].mxu1 }
 0xcf3   : > { %v4297_v32 = vpop.f32.mrb[16].mxu1 }
 0xcf4   : > { %v3457_v33 = vpop.f32.mrb[17].mxu1 }
 0xcf7   : > { %v2135_v34 = vpop.f32.mrb[18].mxu1 }
 0xcf8   : > { %v3467_v35 = vpop.f32.mrb[19].mxu1  ;;  %v2139_v36 = vsel %vm532_vm8, %v2135_v34, -inf }
 0xcf9   : > { %2140 = vmax.xlane.f32.xlu0 %v2139_v36 }
 0xd0f   : > { %1907 = vrot.lane.b32.xlu0 %v4150_v53, %s3887_s9  ;;  %s3903_s9 = smov 20  }
 0xd13   : > { %2150 = vrot.lane.b32.xlu0 %v4144_v51, %s3891_s23 }
 0xd17   : > { %2383 = vrot.lane.b32.xlu0 %v4154_v56, %s3892_s11 }
 0xd1b   : > { %2229 = vrot.lane.b32.xlu0 %v4150_v53, %s3890_s21 }
 0xd86   : > { %v2141_v37 = vpop.xlane.xlu0 %2140 }
 0xd87   : > { %v2142_v38 = vsub.f32 %v2135_v34, %v2141_v37 }
 0xd89   : > { %v2143_v39 = vmul.f32 1.442695, %v2142_v38  ;;  %v1017_v38 = vsel %vm532_vm8, %v4236_v46, -inf }
 0xd8a   : > { %v1908_v40 = vpop.permute.xlu0 %1907 }
 0xd8b   : > { %3665 = vpow2.f32 %v2143_v39  ;;  %3459 = vmatpush3.xpose.msk.msra.mxu0 %vm456_vm6, %v1908_v40  ;;  %v1661_v39 = vsel %vm532_vm8, %v4295_v30, -inf }
 0xd8c   : > { %3468 = vmatprep.subr.mxu0 %v3874_v1 }
 0xd8e   : > { %v2151_v42 = vpop.permute.xlu0 %2150  ;;  %3461 = vmatmul.mubr.msk.f32.vlgmr.msra.gmra.mrb[14].mxu0 %vm456_vm6, %v1906_v41 }
 0xd8f   : > { %3469 = vmatpush3.msk.msra.mxu0 %vm549_vm7, %v2151_v42  ;;  %3470 = vmatprep.mubr.msk.f32.mxu0 %vm3873_vm0, %v3874_v1 }
 0xd90   : > { %3478 = vmatprep.subr.mxu0 %v3874_v1 }
 0xd92   : > { %v2384_v43 = vpop.permute.xlu0 %2383 }
 0xd95   : > { %v3666_v44 = vpop.eup %3665 }
 0xd96   : > { %v2230_v45 = vpop.permute.xlu0 %2229  ;;  %v2145_v47 = vsel %vm532_vm8, %v3666_v44, 0.0 }
 0xd97   : > { %2146 = vadd.xlane.f32.xlu1 %v2145_v47  ;;  %3474 = vmatpush3.xpose.msk.msra.mxu1 %vm456_vm6, %v2230_v45 }
 0xd98   : > { %3483 = vmatprep.subr.mxu1 %v3874_v1 }
 0xda8   : > { %2385 = vrot.lane.b32.xlu1 %v4144_v51, %s3893_s12 }
 0xe24   : > { %v2147_v49 = vpop.xlane.xlu1 %2146 }
 0xe25   : > { %3667 = vrcp.f32 %v2147_v49 }
 0xe28   : > { %v2386_v54 = vpop.permute.xlu1 %2385 }
 0xe2f   : > { %v3668_v50 = vpop.eup %3667 }
 0xe30   : > { %v2149_v52 = vmul.f32 %v3668_v50, %v3666_v44 }
 0xe32   : > { %3471 = vmatmul.mubr.msk.f32.vlgmr.msra.gmra.mrb[16].mxu0 %vm456_vm6, %v2149_v52 }
 0xe33   : > { %3479 = vmatpush3.xpose.msk.msra.mxu0 %vm456_vm6, %v2386_v54  ;;  %3480 = vmatprep.mubr.msk.f32.mxu0 %vm3873_vm0, %v3874_v1 }
 0xe34   : > { %3488 = vmatprep.subr.mxu0 %v3874_v1 }
 0xe36   : > { %3481 = vmatmul.mubr.msk.f32.vlgmr.msra.gmra.mrb[18].mxu0 %vm456_vm6, %v2384_v43  ;;  %v700_v43 = vsel %vm532_vm8, %v4188_v11, -inf }
 0xe37   : > { %3490 = vmatprep.mubr.msk.f32.mxu0 %vm3873_vm0, %v3874_v1 }
 0xe61   : > { %v4326_v55 = vpop.f32.mrb[14].mxu0 }
 0xe62   : > { %v3462_v57 = vpop.f32.mrb[15].mxu0  ;;  %v1983_v40 = vsel %vm532_vm8, %v4326_v55, -inf }
 0xf05   : > { %v4328_v58 = vpop.f32.mrb[16].mxu0 }
 0xf06   : > { %v3472_v59 = vpop.f32.mrb[17].mxu0 }
 0xf09   : > { %v2457_v60 = vpop.f32.mrb[18].mxu0 }
 0xf0a   : > { %v3482_v61 = vpop.f32.mrb[19].mxu0  ;;  %v2461_v62 = vsel %vm532_vm8, %v2457_v60, -inf }
 0xf0b   : > { %2462 = vmax.xlane.f32.xlu1 %v2461_v62 }
 0xf1c   : > { %2227 = vrot.lane.b32.xlu1 %v4168_v2, %s3889_s25  ;;  %s3905_s25 = smov 28  }
 0xf20   : > { %2472 = vrot.lane.b32.xlu1 %v4144_v51, %s3894_s30  ;;  %s3301_s30 = sshll.u32 %s3954_s19, 8 }
 0xf24   : > { %2705 = vrot.lane.b32.xlu1 %v4154_v56, %s3895_s6 }
 0xf28   : > { %2873 = vrot.lane.b32.xlu1 %v4150_v53, %s3896_s7 }
 0xf2c   : > { %2871 = vrot.lane.b32.xlu1 %v4168_v2, %s3895_s6 }
 0xf98   : > { %v2463_v63 = vpop.xlane.xlu1 %2462 }
 0xf99   : > { %v2464_v0 = vsub.f32 %v2457_v60, %v2463_v63 }
 0xf9b   : > { %v2465_v3 = vmul.f32 1.442695, %v2464_v0 }
 0xf9c   : > { %v2228_v4 = vpop.permute.xlu1 %2227 }
 0xf9d   : > { %3669 = vpow2.f32 %v2465_v3  ;;  %3476 = vmatmul.mubr.msk.f32.vlgmr.msra.gmra.mrb[20].mxu1 %vm456_vm6, %v2228_v4 }
 0xf9e   : > { %3485 = vmatprep.mubr.msk.f32.mxu1 %vm3873_vm0, %v3874_v1 }
 0xfa0   : > { %v2473_v5 = vpop.permute.xlu1 %2472 }
 0xfa1   : > { %3484 = vmatpush3.msk.msra.mxu1 %vm549_vm7, %v2473_v5 }
 0xfa2   : > { %3493 = vmatprep.subr.mxu1 %v3874_v1 }
 0xfa4   : > { %v2706_v14 = vpop.permute.xlu1 %2705 }
 0xfa7   : > { %v3670_v56 = vpop.eup %3669 }
 0xfa8   : > { %v2467_v6 = vsel %vm532_vm8, %v3670_v56, 0.0 }
 0xfa9   : > { %2468 = vadd.xlane.f32.xlu0 %v2467_v6 }
 0xfbf   : > { %2707 = vrot.lane.b32.xlu0 %v4144_v51, %s3896_s7 }
 0xfc3   : > { %2551 = vrot.lane.b32.xlu0 %v4150_v53, %s3893_s12  ;;  %v2874_v53 = vpop.permute.xlu1 %2873 }
 0xfc7   : > { %2549 = vrot.lane.b32.xlu0 %v4168_v2, %s3892_s11  ;;  %v2872_v2 = vpop.permute.xlu1 %2871  ;;  %s244_s11 = scalar_lea.vmem [#allocation9], %s3238_s10  ;;  %s3124_s10 = scalar_lea.sflag [#allocation5], %s4114_s8 }
 0xfc8   : > { %s3137_s12 = sshll.u32 %s244_s11, 4  ;;  %s4504_s12 = int_to_ptr.vmem [resolvable:$true] %s3137_s12 }
 0xfc9   : > { %s3795_s19 = scalar_lea.vmem %s4504_s12, 256 }
 0xfca   : > { %p3796_p11 = scmp.ne.s32.totalorder %s4504_s12, %s3795_s19 }
 0xfcc   : > { %p3797_p2 = pnand %p3796_p11, %p4574_p0 }
 0xfce   : > { %p3798_p3 = pneg %p3797_p2 }
0x1036   : > { %v2469_v7 = vpop.xlane.xlu0 %2468 }
0x1037   : > { %3671 = vrcp.f32 %v2469_v7 }
0x103a   : > { %v2708_v9 = vpop.permute.xlu0 %2707 }
0x103e   : > { %v2552_v12 = vpop.permute.xlu0 %2551 }
0x103f   : > { %3489 = vmatpush3.xpose.msk.msra.mxu0 %vm456_vm6, %v2552_v12 }
0x1040   : > { %3498 = vmatprep.subr.mxu0 %v3874_v1 }
0x1041   : > { %v3672_v15 = vpop.eup %3671 }
0x1042   : > { %v2471_v16 = vmul.f32 %v3672_v15, %v3670_v56  ;;  %v2550_v17 = vpop.permute.xlu0 %2549 }
0x1043   : > { %3491 = vmatmul.mubr.msk.f32.vlgmr.msra.gmra.mrb[20].mxu0 %vm456_vm6, %v2550_v17 }
0x1044   : > { %3486 = vmatmul.mubr.msk.f32.vlgmr.msra.gmra.mrb[22].mxu1 %vm456_vm6, %v2471_v16  ;;  %3500 = vmatprep.mubr.msk.f32.mxu0 %vm3873_vm0, %v3874_v1 }
0x1045   : > { %3494 = vmatpush3.xpose.msk.msra.mxu1 %vm456_vm6, %v2708_v9  ;;  %3495 = vmatprep.mubr.msk.f32.mxu1 %vm3873_vm0, %v3874_v1 }
0x1046   : > { %3503 = vmatprep.subr.mxu1 %v3874_v1 }
0x1048   : > { %3496 = vmatmul.mubr.msk.f32.vlgmr.msra.gmra.mrb[24].mxu1 %vm456_vm6, %v2706_v14 }
0x1049   : > { %3504 = vmatpush3.xpose.msk.msra.mxu1 %vm456_vm6, %v2874_v53  ;;  %3505 = vmatprep.mubr.msk.f32.mxu1 %vm3873_vm0, %v3874_v1 }
0x104c   : > { %3506 = vmatmul.mubr.msk.f32.vlgmr.msra.gmra.mrb[26].mxu1 %vm456_vm6, %v2872_v2 }
0x1070   : > { %v2301_v18 = vpop.f32.mrb[20].mxu1 }
0x1071   : > { %v3477_v19 = vpop.f32.mrb[21].mxu1  ;;  %v2305_v1 = vsel %vm532_vm8, %v2301_v18, -inf }
0x1116   : > { %v4363_v20 = vpop.f32.mrb[20].mxu0 }
0x1117   : > { %v4365_v21 = vpop.f32.mrb[22].mxu1  ;;  %v3492_v22 = vpop.f32.mrb[21].mxu0  ;;  %v2627_v41 = vsel %vm532_vm8, %v4363_v20, -inf }
0x1118   : > { %v3487_v23 = vpop.f32.mrb[23].mxu1 }
0x111b   : > { %v2779_v24 = vpop.f32.mrb[24].mxu1 }
0x111c   : > { %v3497_v25 = vpop.f32.mrb[25].mxu1  ;;  %v2783_v26 = vsel %vm532_vm8, %v2779_v24, -inf }
0x111d   : > { %2784 = vmax.xlane.f32.xlu0 %v2783_v26 }
0x111f   : > { %v4368_v27 = vpop.f32.mrb[26].mxu1 }
0x1120   : > { %v3507_v29 = vpop.f32.mrb[27].mxu1  ;;  %v2949_v42 = vsel %vm532_vm8, %v4368_v27, -inf }
0x1133   : > { %2794 = vrot.lane.b32.xlu0 %v4144_v51, %s3897_s28  ;;  %v1339_v51 = vsel %vm532_vm8, %v4268_v8, -inf  ;;  %s4509_s28 = scalar_lea.hbm %s4560_s4, %s3301_s30 }
0x1152   : > { %2306 = vmax.xlane.f32.xlu0 %v2305_v1 }
0x11aa   : > { %v2785_v31 = vpop.xlane.xlu0 %2784 }
0x11ab   : > { %v2786_v33 = vsub.f32 %v2779_v24, %v2785_v31 }
0x11ad   : > { %v2787_v34 = vmul.f32 1.442695, %v2786_v33 }
0x11ae   : > { %v2795_v35 = vpop.permute.xlu0 %2794 }
0x11af   : > { %3673 = vpow2.f32 %v2787_v34  ;;  %3499 = vmatpush3.msk.msra.mxu0 %vm549_vm7, %v2795_v35 }
0x11b9   : > { %v3674_v36 = vpop.eup %3673 }
0x11ba   : > { %v2789_v37 = vsel %vm532_vm8, %v3674_v36, 0.0 }
0x11bb   : > { %2790 = vadd.xlane.f32.xlu1 %v2789_v37 }
0x11bf   : > { %1018 = vmax.xlane.f32.xlu1 %v1017_v38 }
0x11c3   : > { %1340 = vmax.xlane.f32.xlu1 %v1339_v51 }
0x11c7   : > { %1662 = vmax.xlane.f32.xlu1 %v1661_v39 }
0x11cb   : > { %1984 = vmax.xlane.f32.xlu1 %v1983_v40 }
0x11cf   : > { %2628 = vmax.xlane.f32.xlu1 %v2627_v41 }
0x11d3   : > { %2950 = vmax.xlane.f32.xlu1 %v2949_v42 }
0x11d7   : > { %701 = vmax.xlane.f32.xlu1 %v700_v43 }
0x11df   : > { %v2307_v59 = vpop.xlane.xlu0 %2306 }
0x11e0   : > { %v2308_v63 = vsub.f32 %v2301_v18, %v2307_v59 }
0x11e2   : > { %v2309_v5 = vmul.f32 1.442695, %v2308_v63 }
0x1248   : > { %v2791_v44 = vpop.xlane.xlu1 %2790 }
0x1249   : > { %3675 = vrcp.f32 %v2791_v44 }
0x124c   : > { %v1019_v45 = vpop.xlane.xlu1 %1018 }
0x124d   : > { %v1020_v47 = vsub.f32 %v4236_v46, %v1019_v45 }
0x124f   : > { %v1021_v49 = vmul.f32 1.442695, %v1020_v47 }
0x1250   : > { %v1341_v50 = vpop.xlane.xlu1 %1340 }
0x1251   : > { %3677 = vpow2.f32 %v1021_v49  ;;  %v1342_v52 = vsub.f32 %v4268_v8, %v1341_v50 }
0x1253   : > { %v3676_v54 = vpop.eup %3675  ;;  %v1343_v57 = vmul.f32 1.442695, %v1342_v52 }
0x1254   : > { %v2793_v60 = vmul.f32 %v3676_v54, %v3674_v36  ;;  %v1663_v61 = vpop.xlane.xlu1 %1662 }
0x1255   : > { %3679 = vpow2.f32 %v1343_v57  ;;  %v1664_v62 = vsub.f32 %v4295_v30, %v1663_v61 }
0x1256   : > { %3501 = vmatmul.mubr.msk.f32.vlgmr.msra.gmra.mrb[22].mxu0 %vm456_vm6, %v2793_v60 }
0x1257   : > { %v1665_v0 = vmul.f32 1.442695, %v1664_v62 }
0x1258   : > { %v1985_v3 = vpop.xlane.xlu1 %1984 }
0x1259   : > { %3681 = vpow2.f32 %v1665_v0  ;;  %v1986_v46 = vsub.f32 %v4326_v55, %v1985_v3 }
0x125b   : > { %v3678_v4 = vpop.eup %3677  ;;  %v1987_v56 = vmul.f32 1.442695, %v1986_v46 }
0x125c   : > { %v2629_v8 = vpop.xlane.xlu1 %2628  ;;  %v1023_v6 = vsel %vm532_vm8, %v3678_v4, 0.0 }
0x125d   : > { %3683 = vpow2.f32 %v1987_v56  ;;  %v2630_v7 = vsub.f32 %v4363_v20, %v2629_v8  ;;  %1024 = vadd.xlane.f32.xlu1 %v1023_v6  ;;  %v3898_v6 = vmov 1966171168  }
0x125e   : > { %3685 = vpow2.f32 %v2309_v5 }
0x125f   : > { %v3680_v9 = vpop.eup %3679  ;;  %v2631_v30 = vmul.f32 1.442695, %v2630_v7  ;;  %v716_v7 = vunpack.c.l.s4 %v3898_v6 }
0x1260   : > { %v2951_v12 = vpop.xlane.xlu1 %2950  ;;  %v1345_v14 = vsel %vm532_vm8, %v3680_v9, 0.0 }
0x1261   : > { %3687 = vpow2.f32 %v2631_v30  ;;  %v2952_v15 = vsub.f32 %v4368_v27, %v2951_v12  ;;  %1346 = vadd.xlane.f32.xlu1 %v1345_v14  ;;  %v717_v30 = vunpack.c.0.s8 %v716_v7 }
0x1263   : > { %v3682_v55 = vpop.eup %3681  ;;  %v2953_v16 = vmul.f32 1.442695, %v2952_v15 }
0x1264   : > { %v702_v17 = vpop.xlane.xlu1 %701  ;;  %v1667_v53 = vsel %vm532_vm8, %v3682_v55, 0.0 }
0x1265   : > { %3689 = vpow2.f32 %v2953_v16  ;;  %v703_v2 = vsub.f32 %v4188_v11, %v702_v17  ;;  %1668 = vadd.xlane.f32.xlu1 %v1667_v53 }
0x1267   : > { %v3684_v18 = vpop.eup %3683  ;;  %v704_v19 = vmul.f32 1.442695, %v703_v2 }
0x1268   : > { %v1989_v20 = vsel %vm532_vm8, %v3684_v18, 0.0  ;;  %v3686_v22 = vpop.eup %3685 }
0x1269   : > { %3691 = vpow2.f32 %v704_v19  ;;  %1990 = vadd.xlane.f32.xlu1 %v1989_v20  ;;  %v2311_v24 = vsel %vm532_vm8, %v3686_v22, 0.0 }
0x126b   : > { %v3688_v23 = vpop.eup %3687 }
0x126c   : > { %v2633_v25 = vsel %vm532_vm8, %v3688_v23, 0.0 }
0x126d   : > { %2312 = vadd.xlane.f32.xlu1 %v2311_v24  ;;  %2634 = vadd.xlane.f32.xlu0 %v2633_v25 }
0x126f   : > { %v3690_v26 = vpop.eup %3689 }
0x1270   : > { %v2955_v27 = vsel %vm532_vm8, %v3690_v26, 0.0 }
0x1271   : > { %2956 = vadd.xlane.f32.xlu1 %v2955_v27 }
0x1273   : > { %v3692_v11 = vpop.eup %3691 }
0x1274   : > { %v706_v29 = vsel %vm532_vm8, %v3692_v11, 0.0 }
0x1275   : > { %707 = vadd.xlane.f32.xlu0 %v706_v29 }
0x12ea   : > { %v1025_v1 = vpop.xlane.xlu1 %1024 }
0x12eb   : > { %3693 = vrcp.f32 %v1025_v1 }
0x12ee   : > { %v1347_v31 = vpop.xlane.xlu1 %1346 }
0x12ef   : > { %3695 = vrcp.f32 %v1347_v31 }
0x12f2   : > { %v1669_v33 = vpop.xlane.xlu1 %1668 }
0x12f3   : > { %3697 = vrcp.f32 %v1669_v33 }
0x12f5   : > { %v3694_v34 = vpop.eup %3693 }
0x12f6   : > { %v1991_v35 = vpop.xlane.xlu1 %1990  ;;  %v1027_v36 = vmul.f32 %v3694_v34, %v3678_v4 }
0x12f7   : > { %3699 = vrcp.f32 %v1991_v35 }
0x12f8   : > { %v1028_v37 = vsel %vm532_vm8, %v1027_v36, 0.0 }
0x12f9   : > { %v3696_v38 = vpop.eup %3695  ;;  %1029 = vadd.xlane.f32.xlu1 %v1028_v37 }
0x12fa   : > { %v2635_v51 = vpop.xlane.xlu0 %2634  ;;  %v2313_v39 = vpop.xlane.xlu1 %2312  ;;  %v1349_v40 = vmul.f32 %v3696_v38, %v3680_v9  ;;  %v718_v9 = vlaneseq }
0x12fb   : > { %3701 = vrcp.f32 %v2635_v51 }
0x12fc   : > { %3703 = vrcp.f32 %v2313_v39  ;;  %v1350_v41 = vsel %vm532_vm8, %v1349_v40, 0.0  ;;  %v719_v12 = vshrl.u32 %v718_v9, 7 }
0x12fd   : > { %v3698_v42 = vpop.eup %3697  ;;  %1351 = vadd.xlane.f32.xlu0 %v1350_v41 }
0x12fe   : > { %v2957_v43 = vpop.xlane.xlu1 %2956  ;;  %v1671_v44 = vmul.f32 %v3698_v42, %v3682_v55  ;;  %v4414_v14 = vsub.s32 %v717_v30, %v719_v12 }
0x12ff   : > { %3705 = vrcp.f32 %v2957_v43 }
0x1300   : > { %v1672_v45 = vsel %vm532_vm8, %v1671_v44, 0.0  ;;  %v1038_v15 = vrot.slane %v4206_v28, %v4414_v14  ;;  %v1360_v16 = vrot.slane %v4238_v48, %v4414_v14  ;;  %v721_v29 = vrot.slane %v4190_v13, %v4414_v14 }
0x1301   : > { %v3700_v47 = vpop.eup %3699  ;;  %1673 = vadd.xlane.f32.xlu1 %v1672_v45  ;;  %v2326_v31 = vrot.slane %v4328_v58, %v4414_v14 }
0x1302   : > { %v708_v49 = vpop.xlane.xlu0 %707  ;;  %v1993_v50 = vmul.f32 %v3700_v47, %v3684_v18  ;;  %v1039_v55 = vcombine.high %v1038_v15, %v1038_v15  ;;  %v1046_v17 = vrot.slane %v1038_v15, %v4414_v14  ;;  %v1361_v2 = vcombine.high %v1360_v16, %v1360_v16 }
0x1303   : > { %3707 = vrcp.f32 %v708_v49  ;;  %v1682_v18 = vrot.slane %v4270_v10, %v4414_v14  ;;  %v1368_v28 = vrot.slane %v1360_v16, %v4414_v14  ;;  %v722_v44 = vcombine.high %v721_v29, %v721_v29 }
0x1304   : > { %v1994_v52 = vsel %vm532_vm8, %v1993_v50, 0.0  ;;  %v1053_v53 = vrot.slane %v1039_v55, %v4414_v14  ;;  %v1054_v19 = vcombine.high %v1046_v17, %v1046_v17  ;;  %v1375_v48 = vrot.slane %v1361_v2, %v4414_v14 }
0x1305   : > { %v3702_v54 = vpop.eup %3701  ;;  %1995 = vadd.xlane.f32.xlu0 %v1994_v52  ;;  %v1683_v25 = vcombine.high %v1682_v18, %v1682_v18  ;;  %v1690_v1 = vrot.slane %v1682_v18, %v4414_v14  ;;  %v4445_v58 = vrot.slane %v721_v29, %v4414_v14  ;;  %v2327_v47 = vcombine.high %v2326_v31, %v2326_v31 }
0x1306   : > { %v3704_v57 = vpop.eup %3703  ;;  %v2637_v59 = vmul.f32 %v3702_v54, %v3688_v23  ;;  %v1055_v20 = vcombine.high %v1053_v53, %v1053_v53  ;;  %v4426_v23 = vsub.s32 0, %v719_v12  ;;  %v1377_v38 = vcombine.high %v1375_v48, %v1375_v48 }
0x1307   : > { %v2315_v60 = vmul.f32 %v3704_v57, %v3686_v22  ;;  %v2004_v22 = vrot.slane %v4297_v32, %v4414_v14  ;;  %v1376_v32 = vcombine.high %v1368_v28, %v1368_v28  ;;  %v1697_v40 = vrot.slane %v1683_v25, %v4414_v14 }
0x1308   : > { %v2638_v61 = vsel %vm532_vm8, %v2637_v59, 0.0  ;;  %v1059_v24 = vrot.slane %v1046_v17, %v4426_v23  ;;  %v1067_v27 = vrot.slane %v1054_v19, %v4426_v23  ;;  %v1071_v10 = vrot.slane %v1055_v20, %v4426_v23 }
0x1309   : > { %v3706_v62 = vpop.eup %3705  ;;  %2639 = vadd.xlane.f32.xlu0 %v2638_v61  ;;  %v2316_v63 = vsel %vm532_vm8, %v2315_v60, 0.0  ;;  %v1381_v51 = vrot.slane %v1368_v28, %v4426_v23  ;;  %v1385_v39 = vrot.slane %v1375_v48, %v4426_v23  ;;  %v2012_v13 = vrot.slane %v2004_v22, %v4414_v14 }
0x130a   : > { %2317 = vadd.xlane.f32.xlu1 %v2316_v63  ;;  %v2959_v0 = vmul.f32 %v3706_v62, %v3690_v26  ;;  %v1063_v26 = vrot.slane %v1053_v53, %v4426_v23  ;;  %v1389_v45 = vrot.slane %v1376_v32, %v4426_v23  ;;  %v1698_v50 = vcombine.high %v1690_v1, %v1690_v1 }
0x130b   : > { %v2648_v52 = vrot.slane %v4365_v21, %v4414_v14  ;;  %v1699_v59 = vcombine.high %v1697_v40, %v1697_v40  ;;  %v1703_v60 = vrot.slane %v1690_v1, %v4426_v23  ;;  %v1707_v61 = vrot.slane %v1697_v40, %v4426_v23 }
0x130c   : > { %v2960_v3 = vsel %vm532_vm8, %v2959_v0, 0.0  ;;  %v1393_v62 = vrot.slane %v1377_v38, %v4426_v23  ;;  %v2020_v63 = vcombine.high %v2012_v13, %v2012_v13  ;;  %v2341_v21 = vrot.slane %v2327_v47, %v4414_v14 }
0x130d   : > { %v3708_v46 = vpop.eup %3707  ;;  %v1711_v7 = vrot.slane %v1698_v50, %v4426_v23  ;;  %v2649_v9 = vcombine.high %v2648_v52, %v2648_v52  ;;  %v2025_v15 = vrot.slane %v2012_v13, %v4426_v23  ;;  %v1715_v17 = vrot.slane %v1699_v59, %v4426_v23 }
0x130e   : > { %2961 = vadd.xlane.f32.xlu1 %v2960_v3  ;;  %v710_v4 = vmul.f32 %v3708_v46, %v3692_v11  ;;  %v2005_v11 = vcombine.high %v2004_v22, %v2004_v22  ;;  %v2334_v3 = vrot.slane %v2326_v31, %v4414_v14  ;;  %v2033_v53 = vrot.slane %v2020_v63, %v4426_v23 }
0x130f   : > { %v2343_v20 = vcombine.high %v2341_v21, %v2341_v21  ;;  %v2656_v25 = vrot.slane %v2648_v52, %v4414_v14  ;;  %v742_v29 = vrot.slane %v4445_v58, %v4426_v23 }
0x1310   : > { %v711_v5 = vsel %vm532_vm8, %v710_v4, 0.0  ;;  %v2019_v41 = vrot.slane %v2005_v11, %v4414_v14  ;;  %v4455_v4 = vrot.slane %v722_v44, %v4414_v14  ;;  %v2342_v2 = vcombine.high %v2334_v3, %v2334_v3 }
0x1311   : > { %712 = vadd.xlane.f32.xlu0 %v711_v5  ;;  %v737_v11 = vcombine.high %v4445_v58, %v4445_v58  ;;  %v2347_v1 = vrot.slane %v2334_v3, %v4426_v23  ;;  %v2359_v38 = vrot.slane %v2343_v20, %v4426_v23  ;;  %v2669_v13 = vrot.slane %v2656_v25, %v4426_v23 }
0x1312   : > { %v2021_v0 = vcombine.high %v2019_v41, %v2019_v41  ;;  %v2029_v55 = vrot.slane %v2019_v41, %v4426_v23  ;;  %v746_v47 = vrot.slane %v4455_v4, %v4426_v23 }
0x1313   : > { %v750_v63 = vrot.slane %v737_v11, %v4426_v23 }
0x1314   : > { %v2037_v18 = vrot.slane %v2021_v0, %v4426_v23 }
0x1329   : > { %v4412_v56 = vpop.f32.mrb[22].mxu0 }
0x132a   : > { %v3502_v8 = vpop.f32.mrb[23].mxu0  ;;  %v2970_v16 = vrot.slane %v4412_v56, %v4414_v14  ;;  %v2663_v56 = vrot.slane %v2649_v9, %v4414_v14 }
0x132c   : > { %v2971_v32 = vcombine.high %v2970_v16, %v2970_v16  ;;  %v2665_v40 = vcombine.high %v2663_v56, %v2663_v56  ;;  %v2673_v41 = vrot.slane %v2663_v56, %v4426_v23 }
0x132e   : > { %v2985_v44 = vrot.slane %v2971_v32, %v4414_v14 }
0x1386   : > { %v1030_v33 = vpop.xlane.xlu1 %1029 }
0x1387   : > { %v1076_v34 = vmul.f32 %v1059_v24, %v1030_v33  ;;  %v1077_v35 = vmul.f32 %v1063_v26, %v1030_v33  ;;  %v1078_v36 = vmul.f32 %v1067_v27, %v1030_v33  ;;  %v1079_v37 = vmul.f32 %v1071_v10, %v1030_v33 }
0x1388   : > { %v738_v10 = vcombine.high %v4455_v4, %v4455_v4  ;;  %v3032_v4 = vld [vmem:[#allocation8 + $0x18] sm:$0xff] }
0x1389   : > { %v1085_v42 = vcombine.low %v1078_v36, %v1079_v37  ;;  %v1084_v43 = vcombine.low %v1076_v34, %v1077_v35  ;;  %v2351_v35 = vrot.slane %v2341_v21, %v4426_v23  ;;  %v2355_v36 = vrot.slane %v2342_v2, %v4426_v23  ;;  %v3031_v21 = vld [vmem:[#allocation8 + $0x10] sm:$0xff] }
0x138a   : > { %v1352_v49 = vpop.xlane.xlu0 %1351 }
0x138b   : > { %v1398_v54 = vmul.f32 %v1381_v51, %v1352_v49  ;;  %v1399_v57 = vmul.f32 %v1385_v39, %v1352_v49  ;;  %1088 = vrot.lane.b32.xlu0 %v1085_v42, %s3899_s27  ;;  %1086 = vrot.lane.b32.xlu1 %v1084_v43, %s3899_s27  ;;  %v1400_v5 = vmul.f32 %v1389_v45, %v1352_v49  ;;  %s3906_s27 = smov [#allocation9]  }
0x138c   : > { %v1401_v8 = vmul.f32 %v1393_v62, %v1352_v49  ;;  %v2664_v39 = vcombine.high %v2656_v25, %v2656_v25  ;;  %v2978_v43 = vrot.slane %v2970_v16, %v4414_v14  ;;  %v2681_v14 = vrot.slane %v2665_v40, %v4426_v23 }
0x138d   : > { %v1406_v46 = vcombine.low %v1398_v54, %v1399_v57  ;;  %v3029_v54 = vld [vmem:[#allocation8] sm:$0xff]  ;;  %v3030_v57 = vld [vmem:[#allocation8 + $0x8] sm:$0xff] }
0x138e   : > { %v1674_v6 = vpop.xlane.xlu1 %1673  ;;  %v1407_v48 = vcombine.low %v1400_v5, %v1401_v8  ;;  %v3531_v62 = vpack.c.bf16 %v3030_v57, %v3029_v54  ;;  %v2677_v0 = vrot.slane %v2664_v39, %v4426_v23  ;;  %v2986_v5 = vcombine.high %v2978_v43, %v2978_v43 }
0x138f   : > { %v1720_v30 = vmul.f32 %v1703_v60, %v1674_v6  ;;  %v1721_v12 = vmul.f32 %v1707_v61, %v1674_v6  ;;  %1408 = vrot.lane.b32.xlu1 %v1406_v46, %s3900_s20  ;;  %v1722_v22 = vmul.f32 %v1711_v7, %v1674_v6  ;;  %v1723_v28 = vmul.f32 %v1715_v17, %v1674_v6 }
0x1390   : > { %v754_v46 = vrot.slane %v738_v10, %v4426_v23  ;;  %v2987_v8 = vcombine.high %v2985_v44, %v2985_v44  ;;  %v2991_v6 = vrot.slane %v2978_v43, %v4426_v23  ;;  %v2995_v7 = vrot.slane %v2985_v44, %v4426_v23  ;;  %3532 = vmatprep.subr.bf16.mxu0 %v3531_v62 }
0x1391   : > { %v1728_v19 = vcombine.low %v1720_v30, %v1721_v12  ;;  %v1729_v51 = vcombine.low %v1722_v22, %v1723_v28  ;;  %v3535_v12 = vpack.c.bf16 %v3032_v4, %v3031_v21  ;;  %3534 = vmatpush3.bf16.msra.mxu0 %v3531_v62  ;;  %v2999_v22 = vrot.slane %v2986_v5, %v4426_v23 }
0x1392   : > { %v1996_v24 = vpop.xlane.xlu0 %1995  ;;  %v3003_v28 = vrot.slane %v2987_v8, %v4426_v23 }
0x1393   : > { %v2042_v26 = vmul.f32 %v2025_v15, %v1996_v24  ;;  %v2043_v27 = vmul.f32 %v2029_v55, %v1996_v24  ;;  %1730 = vrot.lane.b32.xlu0 %v1728_v19, %s3901_s29  ;;  %1410 = vrot.lane.b32.xlu1 %v1407_v48, %s3900_s20  ;;  %v2044_v31 = vmul.f32 %v2033_v53, %v1996_v24 }
0x1394   : > { %v2045_v33 = vmul.f32 %v2037_v18, %v1996_v24  ;;  %3536 = vmatprep.subr.bf16.mxu0 %v3535_v12 }
0x1395   : > { %v2050_v34 = vcombine.low %v2042_v26, %v2043_v27  ;;  %3538 = vmatpush3.bf16.msra.mxu0 %v3535_v12 }
0x1396   : > { %v2640_v37 = vpop.xlane.xlu0 %2639  ;;  %v2051_v52 = vcombine.low %v2044_v31, %v2045_v33 }
0x1397   : > { %v2318_v42 = vpop.xlane.xlu1 %2317  ;;  %2052 = vrot.lane.b32.xlu0 %v2050_v34, %s3902_s5  ;;  %1732 = vrot.lane.b32.xlu1 %v1729_v51, %s3901_s29  ;;  %v2686_v49 = vmul.f32 %v2669_v13, %v2640_v37  ;;  %v2687_v50 = vmul.f32 %v2673_v41, %v2640_v37  ;;  %v2688_v9 = vmul.f32 %v2677_v0, %v2640_v37  ;;  %v3292_v41 = vld [vmem:[%s4559_s3] ss:$0 sm:$0xff]  ;;  %s3799_s29 = sshll.u32 %s3906_s27, 4  ;;  %s3800_s29 = int_to_ptr.vmem [resolvable:$false] %s3799_s29 }
0x1398   : > { %v2364_v58 = vmul.f32 %v2347_v1, %v2318_v42  ;;  %v2365_v45 = vmul.f32 %v2351_v35, %v2318_v42  ;;  %v2366_v59 = vmul.f32 %v2355_v36, %v2318_v42  ;;  %v2367_v60 = vmul.f32 %v2359_v38, %v2318_v42  ;;  %p3802_p7 = scmp.lt.s32.totalorder %s4504_s12, %s3800_s29 }
0x1399   : > { %v2689_v30 = vmul.f32 %v2681_v14, %v2640_v37  ;;  %v2694_v53 = vcombine.low %v2686_v49, %v2687_v50 }
0x139a   : > { %v2372_v61 = vcombine.low %v2364_v58, %v2365_v45  ;;  %v2373_v17 = vcombine.low %v2366_v59, %v2367_v60 }
0x139b   : > { %v2962_v3 = vpop.xlane.xlu1 %2961  ;;  %2054 = vrot.lane.b32.xlu1 %v2051_v52, %s3902_s5  ;;  %v2695_v26 = vcombine.low %v2688_v9, %v2689_v30  ;;  %s3801_s5 = scalar_lea.vmem %s3800_s29, 512 }
0x139c   : > { %2374 = vrot.lane.b32.xlu0 %v2372_v61, %s3903_s9  ;;  %v3008_v15 = vmul.f32 %v2991_v6, %v2962_v3  ;;  %v3009_v55 = vmul.f32 %v2995_v7, %v2962_v3  ;;  %v3010_v25 = vmul.f32 %v2999_v22, %v2962_v3  ;;  %v3011_v56 = vmul.f32 %v3003_v28, %v2962_v3  ;;  %p3803_p9 = scmp.lt.s32.totalorder %s3801_s5, %s3795_s19 }
0x139e   : > { %v713_v16 = vpop.xlane.xlu0 %712  ;;  %v3016_v27 = vcombine.low %v3008_v15, %v3009_v55  ;;  %v3017_v11 = vcombine.low %v3010_v25, %v3011_v56  ;;  %p3804_p12 = por %p3803_p9, %p3802_p7 }
0x139f   : > { %v759_v2 = vmul.f32 %v742_v29, %v713_v16  ;;  %v760_v18 = vmul.f32 %v746_v47, %v713_v16  ;;  %v761_v19 = vmul.f32 %v750_v63, %v713_v16  ;;  %v762_v20 = vmul.f32 %v754_v46, %v713_v16  ;;  %2376 = vrot.lane.b32.xlu1 %v2373_v17, %s3903_s9 }
0x13a0   : > { %2696 = vrot.lane.b32.xlu0 %v2694_v53, %s3904_s24  ;;  %p3805_p1 = pnand %p3804_p12, %p3798_p3 }
0x13a1   : > { %v767_v24 = vcombine.low %v759_v2, %v760_v18  ;;  %v768_v48 = vcombine.low %v761_v19, %v762_v20 }
0x13a3   : > { %771 = vst.msk [vmem:[#allocation2] sm:$0xff] %vm456_vm6, %v767_v24  ;;  %772 = vst.msk [vmem:[#allocation2 + $0x8] sm:$0xff] %vm456_vm6, %v768_v48  ;;  %2698 = vrot.lane.b32.xlu1 %v2695_v26, %s3904_s24 }
0x13a4   : > { %3018 = vrot.lane.b32.xlu0 %v3016_v27, %s3905_s25 }
0x13a7   : > { %3020 = vrot.lane.b32.xlu1 %v3017_v11, %s3905_s25 }
0x13fd   : > { %v1089_v23 = vpop.permute.xlu0 %1088  ;;  %v1087_v10 = vpop.permute.xlu1 %1086 }
0x13fe   : > { %1094 = vst.msk [vmem:[#allocation2 + $0x8] sm:$0xff] %vm1092_vm9, %v1089_v23  ;;  %1093 = vst.msk [vmem:[#allocation2] sm:$0xff] %vm1092_vm9, %v1087_v10 }
0x1401   : > { %v1409_v29 = vpop.permute.xlu1 %1408 }
0x1402   : > { %1415 = vst.msk [vmem:[#allocation2] sm:$0xff] %vm1414_vm10, %v1409_v29 }
0x1405   : > { %v1731_v32 = vpop.permute.xlu0 %1730  ;;  %v1411_v1 = vpop.permute.xlu1 %1410 }
0x1406   : > { %1737 = vst.msk [vmem:[#allocation2] sm:$0xff] %vm1736_vm11, %v1731_v32 }
0x1407   : > { %1416 = vst.msk [vmem:[#allocation2 + $0x8] sm:$0xff] %vm1414_vm10, %v1411_v1 }
0x1409   : > { %v2053_v31 = vpop.permute.xlu0 %2052  ;;  %v1733_v33 = vpop.permute.xlu1 %1732 }
0x140a   : > { %2059 = vst.msk [vmem:[#allocation2] sm:$0xff] %vm2058_vm12, %v2053_v31 }
0x140b   : > { %1738 = vst.msk [vmem:[#allocation2 + $0x8] sm:$0xff] %vm1736_vm11, %v1733_v33 }
0x140d   : > { %v2055_v34 = vpop.permute.xlu1 %2054 }
0x140e   : > { %v2375_v35 = vpop.permute.xlu0 %2374  ;;  %2060 = vst.msk [vmem:[#allocation2 + $0x8] sm:$0xff] %vm2058_vm12, %v2055_v34 }
0x140f   : > { %2381 = vst.msk [vmem:[#allocation2] sm:$0xff] %vm2380_vm13, %v2375_v35 }
0x1411   : > { %v2377_v36 = vpop.permute.xlu1 %2376 }
0x1412   : > { %v2697_v37 = vpop.permute.xlu0 %2696  ;;  %2382 = vst.msk [vmem:[#allocation2 + $0x8] sm:$0xff] %vm2380_vm13, %v2377_v36 }
0x1413   : > { %2703 = vst.msk [vmem:[#allocation2] sm:$0xff] %vm2702_vm14, %v2697_v37 }
0x1415   : > { %v2699_v38 = vpop.permute.xlu1 %2698 }
0x1416   : > { %2704 = vst.msk [vmem:[#allocation2 + $0x8] sm:$0xff] %vm2702_vm14, %v2699_v38  ;;  %v3019_v51 = vpop.permute.xlu0 %3018 }
0x1417   : > { %3025 = vst.msk [vmem:[#allocation2] sm:$0xff] %vm3024_vm15, %v3019_v51 }
0x1419   : > { %v3021_v39 = vpop.permute.xlu1 %3020 }
0x141a   : > { %3026 = vst.msk [vmem:[#allocation2 + $0x8] sm:$0xff] %vm3024_vm15, %v3021_v39 }
0x141e   : > { %v3027_v40 = vld [vmem:[#allocation2] sm:$0xff] }
0x141f   : > { %3516 = vmatprep.mubr.msk.f32.mxu0 %vm305_vm5, %v3027_v40 }
0x1421   : > { %v3028_v13 = vld [vmem:[#allocation2 + $0x8] sm:$0xff] }
0x1422   : > { %3517 = vmatmul.mubr.msk.f32.vlgmr.msra.gmra.mrb[24].mxu0 %vm305_vm5, %v3028_v13 }
0x14f5   : > { %v3518_v42 = vpop.f32.mrb[24].mxu0 }
0x14f6   : > { %v3118_v43 = vadd.f32 %v3518_v42, %v3292_v41  ;;  %v3112_v44 = vpop.f32.mrb[25].mxu0 }
0x14f7   : > { %v3113_v58 = vadd.f32 %v3292_v41, %v3112_v44 }
0x14f8   : > { %3122 = vst.msk [vmem:[%s244_s11 + $0x8] sm:$0xff] %vm305_vm5, %v3118_v43 }
0x14f9   : > { %3121 = vst.msk [vmem:[%s244_s11] sm:$0xff] %vm305_vm5, %v3113_v58 }
0x14fa   : > { %3808 = shalt.err (!%p3805_p1)
}
0x14fb   : > { %s3809_s9 = scalar_lea.hbm %s4509_s28, 256  ;;  %s3813_s21 = scalar_lea.hbm %s4560_s4, 512 }
0x14fc   : > { %p3810_p13 = scmp.ne.s32.totalorder %s4509_s28, %s3809_s9  ;;  %p3814_p4 = scmp.lt.u32.totalorder %s4509_s28, %s4560_s4 }
0x14fd   : > { %p3815_p5 = scmp.lt.u32.totalorder %s3813_s21, %s3809_s9  ;;  %p3817_p11 = scmp.lt.u32.totalorder %s3809_s9, %s4509_s28 }
0x14fe   : > { %p3811_p6 = pnand %p3810_p13, %p4574_p0 }
0x14ff   : > { %p3816_p8 = por %p3815_p5, %p3814_p4 }
0x1500   : > { %p3812_p10 = pneg %p3811_p6 }
0x1501   : > { %p3818_p2 = por %p3817_p11, %p3816_p8 }
0x1503   : > { %p3819_p3 = pnand %p3818_p2, %p3812_p10 }
0x1505   : > { %3822 = shalt.err (!%p3819_p3)
}
0x1506   : > { %s3907_s30 = smov 128  }
0x1507   : > { %3549 = dma.vmem_to_hbm [thread:$0]  (%p4574_p0), %s4504_s12, 256, %s4509_s28, %s3124_s10, %s3907_s30, %s3907_s30, %s3900_s20  }
0x1508 PF: > { %s3152_s6 = sand.u32 1, %s3853_s15   ;;  %p4575_p7 = scmp.ne.s32.totalorder %s4565_s22, 0 }
0x1509   : > { %p4576_p9 = scmp.ge.s32.totalorder %s3865_s18, 2  ;;  %s3153_s7 = scalar_lea.sflag [#allocation5], %s3152_s6 }
0x150b   : > { %p3563_p12 = pnand %p4576_p9, %p4575_p7 }
0x150d   : > { %3848 = dma.done.wait (!%p3563_p12), %s3153_s7, 256  }
0x150e   : > { %3850 = vsyncadd (!%p3563_p12), %s3153_s7, 4294967040  ;;  %p18_p1 = scmp.ge.s32.totalorder %s4049_s26, 4   ;;  %s4577_s15 = smov %s3857_s16 }
0x150f   : > { %s4578_s16 = smov %s3861_s17  ;;  %s4579_s17 = smov %s4065_s14 }
0x1510   : > { %s4580_s18 = smov %s4049_s26  ;;  %20 = sbr.rel (!%p18_p1) target bundleno = 6 (0x6), region = 89 }
0x1517   :  { %3158 = vsyncpa [#allocation4], 1 }
0x1518   :  { %3160 = vsyncpa [#allocation4 + $0x1], 1 }
0x1519   :  { %3161 = vsyncpa [#allocation7], 1 }
0x151a   :  { %3162 = vsyncpa [#allocation5], 1 }
0x151b   :  { %3164 = vsyncpa [#allocation5 + $0x1], 1 }

</bundles_post_ra>
